<compile_context>
chip_gen: v6e
topology: v6e:2x2x1
jax: 0.10.0
libtpu: 0.0.40
codegen_flags: <defaults>
</compile_context>

<pallas_src>
import functools

import jax
import jax.numpy as jnp
from jax import lax
from jax.experimental import pallas as pl
from jax.experimental.pallas import tpu as pltpu


# ----------------------------- kernel -----------------------------

def _relu(v):
    return jnp.maximum(v, 0.0)


def propnet_kernel(pstep,
                   x_ref,       # [BB, N, Fi]  f32
                   Rrs_ref,     # [BB, 2E, N]  bf16 (Rr stacked over Rs)
                   Rrt_ref,     # [BB, N, E]   bf16 (Rr^T, avoids in-loop transpose)
                   ne_W0_ref,   # [Fi, H]      bf16
                   ee_W0_ref,   # [2Fi, H]     bf16 (fused receiver|sender encoder)
                   w_hh_ref,    # [10, H, H]   bf16 : ne_W1, ne_W2, ee_W1, ee_W2,
                                #                     ep_Wa, ep_Wb, ep_Wc,
                                #                     np_Wa, np_Wb, pr_W1
                   b_ref,       # [10, 1, H]   f32  : ne_b0..2, ee_b0..2, ep_b,
                                #                     np_b, pr_b0, pr_b1
                   pr_W0_ref,   # [2H, H]      bf16 (fused predictor layer 0)
                   pr_W2_ref,   # [H, OUT_W]   bf16
                   pr_b2_ref,   # [1, OUT_W]   f32
                   out_ref):    # [BB, N, OUT_W] f32
    f32, bf16 = jnp.float32, jnp.bfloat16

    x3 = x_ref[...].astype(bf16)                   # [BB, N, Fi]
    Rrs = Rrs_ref[...]                             # [BB, 2E, N] bf16 (exact 0/1)
    Rrt = Rrt_ref[...]                             # [BB, N, E]  bf16
    BB, N, Fi = x3.shape
    E = Rrt.shape[2]

    # ---- hoist all parameter reads (grid-invariant) ----
    ne_W0 = ne_W0_ref[...]
    ee_W0 = ee_W0_ref[...]
    (ne_W1, ne_W2, ee_W1, ee_W2,
     ep_Wa, ep_Wb, ep_Wc,
     np_Wa, np_Wb, pr_W1) = [w_hh_ref[i] for i in range(10)]
    (ne_b0, ne_b1, ne_b2,
     ee_b0, ee_b1, ee_b2,
     ep_b, np_b, pr_b0, pr_b1) = [b_ref[i] for i in range(10)]
    pr_W0 = pr_W0_ref[...]
    pr_W2 = pr_W2_ref[...]
    pr_b2 = pr_b2_ref[...]
    H = ne_W1.shape[0]

    # bf16 x bf16 MXU dots, f32 accumulation.
    def mm(a, w):
        return jnp.dot(a.astype(bf16), w, preferred_element_type=f32)

    # batched incidence product: [BB, R, K] x [BB, K, C] -> [BB, R, C]
    def bmm(r, a):
        return lax.dot_general(r, a.astype(bf16),
                               dimension_numbers=(((2,), (1,)), ((0,), (0,))),
                               preferred_element_type=f32)

    x2 = x3.reshape(BB * N, Fi)

    # ---- node encoder: Linear-ReLU x3 on flattened [BB*N, Fi] ----
    h = _relu(mm(x2, ne_W0) + ne_b0)
    h = _relu(mm(h, ne_W1) + ne_b1)
    node_encode = _relu(mm(h, ne_W2) + ne_b2)             # [BB*N, H] f32

    # ---- edge encoder: one stacked incidence matmul, fused-K first layer ----
    xrs = bmm(Rrs, x3)                                    # [BB, 2E, Fi]
    # lane-concat receiver|sender features (K = 2*Fi fused dot; cheap lane copy
    # for small Fi — verified preferable to 2 underfilled K=Fi pushes).
    x_rs = jnp.concatenate([xrs[:, :E, :], xrs[:, E:, :]], axis=-1)   # [BB, E, 2Fi]
    h = _relu(mm(x_rs.reshape(BB * E, 2 * Fi), ee_W0) + ee_b0)
    h = _relu(mm(h, ee_W1) + ee_b1)
    edge_encode = _relu(mm(h, ee_W2) + ee_b2)             # [BB*E, H] f32

    # ---- loop-invariant terms hoisted out of the propagation loop ----
    # (these do not depend on node_effect; computing them per-iteration wasted
    #  2*(pstep-1) matmuls and repeated bias broadcasts)
    edge_base = mm(edge_encode, ep_Wa) + ep_b             # [BB*E, H]
    node_base = mm(node_encode, np_Wa) + np_b             # [BB*N, H]

    node_effect = node_encode                              # [BB*N, H] f32
    # static Python loop is fine for small pstep (<=4); switch to lax.fori_loop
    # if it grows.
    for _ in range(pstep):
        # Rr@ne and Rs@ne in ONE batched matmul on the stacked incidence.
        nrs = bmm(Rrs, node_effect.reshape(BB, N, H))      # [BB, 2E, H]
        ne_r = nrs[:, :E, :].reshape(BB * E, H)
        ne_s = nrs[:, E:, :].reshape(BB * E, H)
        # edge propagator: split weights kept here so the edge_encode half could
        # be hoisted (1 hoisted + 2 in-loop dots beats a per-iteration lane
        # concat + K=3H dot for small pstep).
        edge_effect = _relu(edge_base + mm(ne_r, ep_Wb) + mm(ne_s, ep_Wc))
        # aggregate edge effects back to nodes with the pre-transposed Rr^T —
        # a plain batched dot, no per-iteration XLU transpose.
        agg = bmm(Rrt, edge_effect.reshape(BB, E, H))      # [BB, N, H]
        # node propagator with residual (node_encode half hoisted above).
        node_effect = _relu(node_base
                            + mm(agg.reshape(BB * N, H), np_Wb)
                            + node_effect)

    # ---- node predictor: fused-K first layer (lane concat, K = 2H), relu,
    #      relu, linear (no final relu) ----
    ne_cat = jnp.concatenate([node_encode, node_effect], axis=-1)   # [BB*N, 2H]
    h = _relu(mm(ne_cat, pr_W0) + pr_b0)
    h = _relu(mm(h, pr_W1) + pr_b1)
    pred = mm(h, pr_W2) + pr_b2                            # [BB*N, OUT_W]

    out_ref[...] = pred.reshape(BB, N, -1).astype(out_ref.dtype)


# ----------------------------- wrapper -----------------------------

def _round_up(v, m):
    return ((v + m - 1) // m) * m


def _vmem_budget_bytes():
    """~3/4 of this generation's VMEM; conservative 64 MiB (v7x) fallback."""
    cap = 64 * 1024 * 1024
    try:
        cap = int(pltpu.get_tpu_info().vmem_capacity_bytes)
    except Exception:
        pass
    return (cap * 3) // 4


def _pick_block_b(B, N, E, Fi, H, out_w, budget):
    """Largest divisor of B that (a) fits the per-step VMEM working set in
    `budget` and (b) leaves a grid of >= 4 steps, so each TensorCore (2 on v7x)
    gets >= 2 steps and input DMA / output writeback stay pipelined."""
    bf16_b, f32_b = 2, 4

    def per_step_bytes(bb):
        io = 2 * (bb * 2 * E * N * bf16_b          # Rrs (double-buffered)
                  + bb * N * E * bf16_b            # Rr^T
                  + bb * N * Fi * f32_b            # x
                  + bb * N * out_w * f32_b)        # output slab
        acts = bb * (4 * E * H + 6 * N * H) * f32_b          # live activations
        wts = 2 * ((12 * H * H + 3 * Fi * H + H * out_w) * bf16_b
                   + (10 * H + out_w) * f32_b)               # params (dbl-buf)
        return io + acts + wts

    bb_cap = max(1, B // 4) if B >= 4 else B
    bb = bb_cap
    while bb > 1 and (B % bb != 0 or per_step_bytes(bb) > budget):
        bb -= 1
    return max(bb, 1)


def propnet_forward(x, Rr, Rs, params, pstep=2, block_b=None):
    f32, bf16 = jnp.float32, jnp.bfloat16
    B, N, Fi = x.shape
    _, E, _ = Rr.shape
    H = params["ne_W1"].shape[0]
    nf_out = params["pr_W2"].shape[1]

    # Only lane-pad the output when it is wide enough to matter; for tiny nf_out
    # the padded slab would inflate HBM writeback 32x.
    OUT_W = _round_up(nf_out, 128) if nf_out >= 32 else nf_out

    # Pad N, E to multiples of 8 so in-kernel sublane slices/reshapes are views.
    N_pad, E_pad = _round_up(N, 8), _round_up(E, 8)
    if N_pad != N:
        x = jnp.pad(x, ((0, 0), (0, 0), (0, 0)) if False else
                    ((0, 0), (0, N_pad - N), (0, 0)))
        Rr = jnp.pad(Rr, ((0, 0), (0, 0), (0, N_pad - N)))
        Rs = jnp.pad(Rs, ((0, 0), (0, 0), (0, N_pad - N)))
    if E_pad != E:
        Rr = jnp.pad(Rr, ((0, 0), (0, E_pad - E), (0, 0)))
        Rs = jnp.pad(Rs, ((0, 0), (0, E_pad - E), (0, 0)))

    budget = _vmem_budget_bytes()
    if block_b is None:
        block_b = _pick_block_b(B, N_pad, E_pad, Fi, H, OUT_W, budget)
    assert B % block_b == 0

    # Rr/Rs stacked into one [B, 2E, N] operand + explicit Rr^T; bf16 is exact
    # for 0/1 incidence and halves HBM traffic of the dominant per-batch tensor.
    Rrs = jnp.concatenate([Rr, Rs], axis=1).astype(bf16)
    Rr_t = jnp.transpose(Rr, (0, 2, 1)).astype(bf16)

    # Split the in-loop fused weights host-side (so the invariant halves can be
    # hoisted in-kernel); keep ee_W0 / pr_W0 fused (lane-concat path in kernel).
    ep_Wa, ep_Wb, ep_Wc = (params["ep_W"][:H], params["ep_W"][H:2 * H],
                           params["ep_W"][2 * H:])
    np_Wa, np_Wb = params["np_W"][:H], params["np_W"][H:]

    # Pack parameters into a few streams; weights bf16, biases f32.
    ne_W0 = params["ne_W0"].astype(bf16)                                 # [Fi, H]
    ee_W0 = params["ee_W0"].astype(bf16)                                 # [2Fi, H]
    w_hh = jnp.stack([params["ne_W1"], params["ne_W2"],
                      params["ee_W1"], params["ee_W2"],
                      ep_Wa, ep_Wb, ep_Wc, np_Wa, np_Wb,
                      params["pr_W1"]]).astype(bf16)                     # [10, H, H]
    b_h = jnp.stack([params["ne_b0"], params["ne_b1"], params["ne_b2"],
                     params["ee_b0"], params["ee_b1"], params["ee_b2"],
                     params["ep_b"], params["np_b"],
                     params["pr_b0"], params["pr_b1"]]).astype(f32)      # [10, 1, H]
    pr_W0 = params["pr_W0"].astype(bf16)                                 # [2H, H]
    pr_W2 = (jnp.zeros((H, OUT_W), f32).at[:, :nf_out]
             .set(params["pr_W2"]).astype(bf16))
    pr_b2 = jnp.zeros((1, OUT_W), f32).at[:, :nf_out].set(params["pr_b2"])

    kernel = functools.partial(propnet_kernel, pstep)

    # NOTE: the 8 grid-invariant parameter streams could be single-buffered via
    # pipeline_mode=pl.Buffered(1) (review suggestion); skipped here for
    # lowering-compat safety — they are tiny relative to the VMEM budget.
    out = pl.pallas_call(
        kernel,
        out_shape=jax.ShapeDtypeStruct((B, N_pad, OUT_W), jnp.float32),
        grid_spec=pltpu.PrefetchScalarGridSpec(
            num_scalar_prefetch=0,
            grid=(B // block_b,),
            in_specs=[
                pl.BlockSpec((block_b, N_pad, Fi), lambda b: (b, 0, 0)),
                pl.BlockSpec((block_b, 2 * E_pad, N_pad), lambda b: (b, 0, 0)),
                pl.BlockSpec((block_b, N_pad, E_pad), lambda b: (b, 0, 0)),
                pl.BlockSpec(ne_W0.shape, lambda b: (0, 0)),
                pl.BlockSpec(ee_W0.shape, lambda b: (0, 0)),
                pl.BlockSpec(w_hh.shape, lambda b: (0, 0, 0)),
                pl.BlockSpec(b_h.shape, lambda b: (0, 0, 0)),
                pl.BlockSpec(pr_W0.shape, lambda b: (0, 0)),
                pl.BlockSpec(pr_W2.shape, lambda b: (0, 0)),
                pl.BlockSpec(pr_b2.shape, lambda b: (0, 0)),
            ],
            out_specs=pl.BlockSpec((block_b, N_pad, OUT_W), lambda b: (b, 0, 0)),
        ),
        compiler_params=pltpu.CompilerParams(
            dimension_semantics=("parallel",),
            vmem_limit_bytes=int(budget),
        ),
    )(x, Rrs, Rr_t, ne_W0, ee_W0, w_hh, b_h, pr_W0, pr_W2, pr_b2)

    return out[:, :N, :nf_out]


# ----------------------------- pure-JAX reference -----------------------------

def propnet_ref(x, Rr, Rs, p, pstep=2):
    relu = lambda v: jnp.maximum(v, 0.0)
    lin = lambda v, W, b: v @ W + b

    def mlp3(v, W0, b0, W1, b1, W2, b2, final_relu):
        h = relu(lin(v, W0, b0))
        h = relu(lin(h, W1, b1))
        h = lin(h, W2, b2)
        return relu(h) if final_relu else h

    node_encode = mlp3(x, p["ne_W0"], p["ne_b0"], p["ne_W1"], p["ne_b1"],
                       p["ne_W2"], p["ne_b2"], True)
    node_effect = node_encode
    x_r = Rr @ x
    x_s = Rs @ x
    edge_encode = mlp3(jnp.concatenate([x_r, x_s], -1),
                       p["ee_W0"], p["ee_b0"], p["ee_W1"], p["ee_b1"],
                       p["ee_W2"], p["ee_b2"], True)
    Rr_t = jnp.swapaxes(Rr, 1, 2)
    for _ in range(pstep):
        ne_r = Rr @ node_effect
        ne_s = Rs @ node_effect
        edge_effect = relu(lin(jnp.concatenate([edge_encode, ne_r, ne_s], -1),
                               p["ep_W"], p["ep_b"]))
        node_agg = Rr_t @ edge_effect
        node_effect = relu(lin(jnp.concatenate([node_encode, node_agg], -1),
                               p["np_W"], p["np_b"]) + node_effect)
    return mlp3(jnp.concatenate([node_encode, node_effect], -1),
                p["pr_W0"], p["pr_b0"], p["pr_W1"], p["pr_b1"],
                p["pr_W2"], p["pr_b2"], False)


# ----------------------------- param init -----------------------------

def init_params(key, nf_input, nf_hidden, nf_output):
    H = nf_hidden
    shapes = {
        "ne_W0": (nf_input, H), "ne_b0": (1, H),
        "ne_W1": (H, H), "ne_b1": (1, H),
        "ne_W2": (H, H), "ne_b2": (1, H),
        "ee_W0": (2 * nf_input, H), "ee_b0": (1, H),
        "ee_W1": (H, H), "ee_b1": (1, H),
        "ee_W2": (H, H), "ee_b2": (1, H),
        "np_W": (2 * H, H), "np_b": (1, H),
        "ep_W": (3 * H, H), "ep_b": (1, H),
        "pr_W0": (2 * H, H), "pr_b0": (1, H),
        "pr_W1": (H, H), "pr_b1": (1, H),
        "pr_W2": (H, nf_output), "pr_b2": (1, nf_output),
    }
    params = {}
    keys = jax.random.split(key, len(shapes))
    for k, (name, shp) in zip(keys, shapes.items()):
        fan_in = shp[0] if "W" in name else shapes[name.replace("b", "W")][0]
        scale = 1.0 / jnp.sqrt(jnp.float32(fan_in))
        params[name] = (jax.random.uniform(k, shp, jnp.float32, -1.0, 1.0) * scale)
    return params


# ----------------------------- main -----------------------------

if __name__ == "__main__":
    B, N, E = 8, 16, 32
    nf_input, nf_hidden, nf_output = 4, 32, 4
    pstep = 2

    key = jax.random.PRNGKey(0)
    k_x, k_rr, k_rs, k_p = jax.random.split(key, 4)

    x = jax.random.normal(k_x, (B, N, nf_input), jnp.float32)
    # binary receiver/sender incidence matrices, as in PropNet usage
    Rr = (jax.random.uniform(k_rr, (B, E, N)) > 0.7).astype(jnp.float32)
    Rs = (jax.random.uniform(k_rs, (B, E, N)) > 0.7).astype(jnp.float32)

    params = init_params(k_p, nf_input, nf_hidden, nf_output)

    out = propnet_forward(x, Rr, Rs, params, pstep=pstep)
    out = jax.block_until_ready(out)

    ref = propnet_ref(x, Rr, Rs, params, pstep=pstep)
    assert out.shape == (B, N, nf_output), out.shape
    # bf16 MXU operands (f32 accumulation) => slightly looser tolerance than f32.
    max_err = float(jnp.max(jnp.abs(out - ref)))
    assert jnp.allclose(out, ref, atol=5e-2, rtol=5e-2), max_err

    print("KERNEL_OK")
</pallas_src>

<mosaic_0001>
module attributes {stable_mosaic.version = 11 : i64} {
  func.func @propnet_kernel(%arg0: i32, %arg1: memref<2x16x4xf32, #tpu.memory_space<vmem>>, %arg2: memref<2x64x16xbf16, #tpu.memory_space<vmem>>, %arg3: memref<2x16x32xbf16, #tpu.memory_space<vmem>>, %arg4: memref<4x32xbf16, #tpu.memory_space<vmem>>, %arg5: memref<8x32xbf16, #tpu.memory_space<vmem>>, %arg6: memref<10x32x32xbf16, #tpu.memory_space<vmem>>, %arg7: memref<10x1x32xf32, #tpu.memory_space<vmem>>, %arg8: memref<64x32xbf16, #tpu.memory_space<vmem>>, %arg9: memref<32x4xbf16, #tpu.memory_space<vmem>>, %arg10: memref<1x4xf32, #tpu.memory_space<vmem>>, %arg11: memref<2x16x4xf32, #tpu.memory_space<vmem>>) attributes {dimension_semantics = [#tpu.dimension_semantics<parallel>], iteration_bounds = array<i64: 4>, scalar_prefetch = 0 : i64, scratch_operands = 0 : i64, tpu.core_type = #tpu.core_type<tc>, window_params = [{transform_indices = @transform_0, window_bounds = array<i64: 2, 16, 4>}, {transform_indices = @transform_1, window_bounds = array<i64: 2, 64, 16>}, {transform_indices = @transform_2, window_bounds = array<i64: 2, 16, 32>}, {pipeline_mode = #tpu.pipeline_mode<synchronous>, transform_indices = @transform_3, window_bounds = array<i64: 4, 32>}, {pipeline_mode = #tpu.pipeline_mode<synchronous>, transform_indices = @transform_4, window_bounds = array<i64: 8, 32>}, {pipeline_mode = #tpu.pipeline_mode<synchronous>, transform_indices = @transform_5, window_bounds = array<i64: 10, 32, 32>}, {pipeline_mode = #tpu.pipeline_mode<synchronous>, transform_indices = @transform_6, window_bounds = array<i64: 10, 1, 32>}, {pipeline_mode = #tpu.pipeline_mode<synchronous>, transform_indices = @transform_7, window_bounds = array<i64: 64, 32>}, {pipeline_mode = #tpu.pipeline_mode<synchronous>, transform_indices = @transform_8, window_bounds = array<i64: 32, 4>}, {pipeline_mode = #tpu.pipeline_mode<synchronous>, transform_indices = @transform_9, window_bounds = array<i64: 1, 4>}, {transform_indices = @transform_10, window_bounds = array<i64: 2, 16, 4>}]} {
    %c0 = arith.constant 0 : index
    %c0_0 = arith.constant 0 : index
    %c0_1 = arith.constant 0 : index
    %0 = vector.load %arg1[%c0, %c0_0, %c0_1] : memref<2x16x4xf32, #tpu.memory_space<vmem>>, vector<2x16x4xf32>
    %1 = arith.truncf %0 : vector<2x16x4xf32> to vector<2x16x4xbf16>
    %c0_2 = arith.constant 0 : index
    %c0_3 = arith.constant 0 : index
    %c0_4 = arith.constant 0 : index
    %2 = vector.load %arg2[%c0_2, %c0_3, %c0_4] : memref<2x64x16xbf16, #tpu.memory_space<vmem>>, vector<2x64x16xbf16>
    %c0_5 = arith.constant 0 : index
    %c0_6 = arith.constant 0 : index
    %c0_7 = arith.constant 0 : index
    %3 = vector.load %arg3[%c0_5, %c0_6, %c0_7] : memref<2x16x32xbf16, #tpu.memory_space<vmem>>, vector<2x16x32xbf16>
    %c0_8 = arith.constant 0 : index
    %c0_9 = arith.constant 0 : index
    %4 = vector.load %arg4[%c0_8, %c0_9] : memref<4x32xbf16, #tpu.memory_space<vmem>>, vector<4x32xbf16>
    %c0_10 = arith.constant 0 : index
    %c0_11 = arith.constant 0 : index
    %5 = vector.load %arg5[%c0_10, %c0_11] : memref<8x32xbf16, #tpu.memory_space<vmem>>, vector<8x32xbf16>
    %c0_12 = arith.constant 0 : index
    %c0_13 = arith.constant 0 : index
    %c0_14 = arith.constant 0 : index
    %6 = vector.load %arg6[%c0_12, %c0_13, %c0_14] : memref<10x32x32xbf16, #tpu.memory_space<vmem>>, vector<1x32x32xbf16>
    %7 = vector.shape_cast %6 : vector<1x32x32xbf16> to vector<32x32xbf16>
    %c1 = arith.constant 1 : index
    %c0_15 = arith.constant 0 : index
    %c0_16 = arith.constant 0 : index
    %8 = vector.load %arg6[%c1, %c0_15, %c0_16] : memref<10x32x32xbf16, #tpu.memory_space<vmem>>, vector<1x32x32xbf16>
    %9 = vector.shape_cast %8 : vector<1x32x32xbf16> to vector<32x32xbf16>
    %c2 = arith.constant 2 : index
    %c0_17 = arith.constant 0 : index
    %c0_18 = arith.constant 0 : index
    %10 = vector.load %arg6[%c2, %c0_17, %c0_18] : memref<10x32x32xbf16, #tpu.memory_space<vmem>>, vector<1x32x32xbf16>
    %11 = vector.shape_cast %10 : vector<1x32x32xbf16> to vector<32x32xbf16>
    %c3 = arith.constant 3 : index
    %c0_19 = arith.constant 0 : index
    %c0_20 = arith.constant 0 : index
    %12 = vector.load %arg6[%c3, %c0_19, %c0_20] : memref<10x32x32xbf16, #tpu.memory_space<vmem>>, vector<1x32x32xbf16>
    %13 = vector.shape_cast %12 : vector<1x32x32xbf16> to vector<32x32xbf16>
    %c4 = arith.constant 4 : index
    %c0_21 = arith.constant 0 : index
    %c0_22 = arith.constant 0 : index
    %14 = vector.load %arg6[%c4, %c0_21, %c0_22] : memref<10x32x32xbf16, #tpu.memory_space<vmem>>, vector<1x32x32xbf16>
    %15 = vector.shape_cast %14 : vector<1x32x32xbf16> to vector<32x32xbf16>
    %c5 = arith.constant 5 : index
    %c0_23 = arith.constant 0 : index
    %c0_24 = arith.constant 0 : index
    %16 = vector.load %arg6[%c5, %c0_23, %c0_24] : memref<10x32x32xbf16, #tpu.memory_space<vmem>>, vector<1x32x32xbf16>
    %17 = vector.shape_cast %16 : vector<1x32x32xbf16> to vector<32x32xbf16>
    %c6 = arith.constant 6 : index
    %c0_25 = arith.constant 0 : index
    %c0_26 = arith.constant 0 : index
    %18 = vector.load %arg6[%c6, %c0_25, %c0_26] : memref<10x32x32xbf16, #tpu.memory_space<vmem>>, vector<1x32x32xbf16>
    %19 = vector.shape_cast %18 : vector<1x32x32xbf16> to vector<32x32xbf16>
    %c7 = arith.constant 7 : index
    %c0_27 = arith.constant 0 : index
    %c0_28 = arith.constant 0 : index
    %20 = vector.load %arg6[%c7, %c0_27, %c0_28] : memref<10x32x32xbf16, #tpu.memory_space<vmem>>, vector<1x32x32xbf16>
    %21 = vector.shape_cast %20 : vector<1x32x32xbf16> to vector<32x32xbf16>
    %c8 = arith.constant 8 : index
    %c0_29 = arith.constant 0 : index
    %c0_30 = arith.constant 0 : index
    %22 = vector.load %arg6[%c8, %c0_29, %c0_30] : memref<10x32x32xbf16, #tpu.memory_space<vmem>>, vector<1x32x32xbf16>
    %23 = vector.shape_cast %22 : vector<1x32x32xbf16> to vector<32x32xbf16>
    %c9 = arith.constant 9 : index
    %c0_31 = arith.constant 0 : index
    %c0_32 = arith.constant 0 : index
    %24 = vector.load %arg6[%c9, %c0_31, %c0_32] : memref<10x32x32xbf16, #tpu.memory_space<vmem>>, vector<1x32x32xbf16>
    %25 = vector.shape_cast %24 : vector<1x32x32xbf16> to vector<32x32xbf16>
    %c0_33 = arith.constant 0 : index
    %c0_34 = arith.constant 0 : index
    %c0_35 = arith.constant 0 : index
    %26 = vector.load %arg7[%c0_33, %c0_34, %c0_35] : memref<10x1x32xf32, #tpu.memory_space<vmem>>, vector<1x1x32xf32>
    %27 = vector.shape_cast %26 : vector<1x1x32xf32> to vector<1x32xf32>
    %c1_36 = arith.constant 1 : index
    %c0_37 = arith.constant 0 : index
    %c0_38 = arith.constant 0 : index
    %28 = vector.load %arg7[%c1_36, %c0_37, %c0_38] : memref<10x1x32xf32, #tpu.memory_space<vmem>>, vector<1x1x32xf32>
    %29 = vector.shape_cast %28 : vector<1x1x32xf32> to vector<1x32xf32>
    %c2_39 = arith.constant 2 : index
    %c0_40 = arith.constant 0 : index
    %c0_41 = arith.constant 0 : index
    %30 = vector.load %arg7[%c2_39, %c0_40, %c0_41] : memref<10x1x32xf32, #tpu.memory_space<vmem>>, vector<1x1x32xf32>
    %31 = vector.shape_cast %30 : vector<1x1x32xf32> to vector<1x32xf32>
    %c3_42 = arith.constant 3 : index
    %c0_43 = arith.constant 0 : index
    %c0_44 = arith.constant 0 : index
    %32 = vector.load %arg7[%c3_42, %c0_43, %c0_44] : memref<10x1x32xf32, #tpu.memory_space<vmem>>, vector<1x1x32xf32>
    %33 = vector.shape_cast %32 : vector<1x1x32xf32> to vector<1x32xf32>
    %c4_45 = arith.constant 4 : index
    %c0_46 = arith.constant 0 : index
    %c0_47 = arith.constant 0 : index
    %34 = vector.load %arg7[%c4_45, %c0_46, %c0_47] : memref<10x1x32xf32, #tpu.memory_space<vmem>>, vector<1x1x32xf32>
    %35 = vector.shape_cast %34 : vector<1x1x32xf32> to vector<1x32xf32>
    %c5_48 = arith.constant 5 : index
    %c0_49 = arith.constant 0 : index
    %c0_50 = arith.constant 0 : index
    %36 = vector.load %arg7[%c5_48, %c0_49, %c0_50] : memref<10x1x32xf32, #tpu.memory_space<vmem>>, vector<1x1x32xf32>
    %37 = vector.shape_cast %36 : vector<1x1x32xf32> to vector<1x32xf32>
    %c6_51 = arith.constant 6 : index
    %c0_52 = arith.constant 0 : index
    %c0_53 = arith.constant 0 : index
    %38 = vector.load %arg7[%c6_51, %c0_52, %c0_53] : memref<10x1x32xf32, #tpu.memory_space<vmem>>, vector<1x1x32xf32>
    %39 = vector.shape_cast %38 : vector<1x1x32xf32> to vector<1x32xf32>
    %c7_54 = arith.constant 7 : index
    %c0_55 = arith.constant 0 : index
    %c0_56 = arith.constant 0 : index
    %40 = vector.load %arg7[%c7_54, %c0_55, %c0_56] : memref<10x1x32xf32, #tpu.memory_space<vmem>>, vector<1x1x32xf32>
    %41 = vector.shape_cast %40 : vector<1x1x32xf32> to vector<1x32xf32>
    %c8_57 = arith.constant 8 : index
    %c0_58 = arith.constant 0 : index
    %c0_59 = arith.constant 0 : index
    %42 = vector.load %arg7[%c8_57, %c0_58, %c0_59] : memref<10x1x32xf32, #tpu.memory_space<vmem>>, vector<1x1x32xf32>
    %43 = vector.shape_cast %42 : vector<1x1x32xf32> to vector<1x32xf32>
    %c9_60 = arith.constant 9 : index
    %c0_61 = arith.constant 0 : index
    %c0_62 = arith.constant 0 : index
    %44 = vector.load %arg7[%c9_60, %c0_61, %c0_62] : memref<10x1x32xf32, #tpu.memory_space<vmem>>, vector<1x1x32xf32>
    %45 = vector.shape_cast %44 : vector<1x1x32xf32> to vector<1x32xf32>
    %c0_63 = arith.constant 0 : index
    %c0_64 = arith.constant 0 : index
    %46 = vector.load %arg8[%c0_63, %c0_64] : memref<64x32xbf16, #tpu.memory_space<vmem>>, vector<64x32xbf16>
    %c0_65 = arith.constant 0 : index
    %c0_66 = arith.constant 0 : index
    %47 = vector.load %arg9[%c0_65, %c0_66] : memref<32x4xbf16, #tpu.memory_space<vmem>>, vector<32x4xbf16>
    %c0_67 = arith.constant 0 : index
    %c0_68 = arith.constant 0 : index
    %48 = vector.load %arg10[%c0_67, %c0_68] : memref<1x4xf32, #tpu.memory_space<vmem>>, vector<1x4xf32>
    %49 = vector.shape_cast %1 : vector<2x16x4xbf16> to vector<32x4xbf16>
    %cst = arith.constant dense<0.000000e+00> : vector<32x32xf32>
    %50 = tpu.matmul %49, %4, %cst {dimension_numbers = #tpu.dot_dimension_numbers<[1], [0], [0], [1], [0, 0, 1, 1], [], []>} : vector<32x4xbf16>, vector<4x32xbf16>, vector<32x32xf32> -> vector<32x32xf32>
    %51 = vector.broadcast %27 : vector<1x32xf32> to vector<32x32xf32>
    %52 = arith.addf %50, %51 : vector<32x32xf32>
    %cst_69 = arith.constant 0.000000e+00 : f32
    %53 = vector.broadcast %cst_69 : f32 to vector<32x32xf32>
    %54 = arith.maximumf %52, %53 : vector<32x32xf32>
    %55 = arith.truncf %54 : vector<32x32xf32> to vector<32x32xbf16>
    %cst_70 = arith.constant dense<0.000000e+00> : vector<32x32xf32>
    %56 = tpu.matmul %55, %7, %cst_70 {dimension_numbers = #tpu.dot_dimension_numbers<[1], [0], [0], [1], [0, 0, 1, 1], [], []>} : vector<32x32xbf16>, vector<32x32xbf16>, vector<32x32xf32> -> vector<32x32xf32>
    %57 = vector.broadcast %29 : vector<1x32xf32> to vector<32x32xf32>
    %58 = arith.addf %56, %57 : vector<32x32xf32>
    %cst_71 = arith.constant 0.000000e+00 : f32
    %59 = vector.broadcast %cst_71 : f32 to vector<32x32xf32>
    %60 = arith.maximumf %58, %59 : vector<32x32xf32>
    %61 = arith.truncf %60 : vector<32x32xf32> to vector<32x32xbf16>
    %cst_72 = arith.constant dense<0.000000e+00> : vector<32x32xf32>
    %62 = tpu.matmul %61, %9, %cst_72 {dimension_numbers = #tpu.dot_dimension_numbers<[1], [0], [0], [1], [0, 0, 1, 1], [], []>} : vector<32x32xbf16>, vector<32x32xbf16>, vector<32x32xf32> -> vector<32x32xf32>
    %63 = vector.broadcast %31 : vector<1x32xf32> to vector<32x32xf32>
    %64 = arith.addf %62, %63 : vector<32x32xf32>
    %cst_73 = arith.constant 0.000000e+00 : f32
    %65 = vector.broadcast %cst_73 : f32 to vector<32x32xf32>
    %66 = arith.maximumf %64, %65 : vector<32x32xf32>
    %cst_74 = arith.constant dense<0.000000e+00> : vector<2x64x4xf32>
    %67 = tpu.matmul %2, %1, %cst_74 {dimension_numbers = #tpu.dot_dimension_numbers<[2], [1], [1], [2], [0, 0, 0, 1, 1, 2], [0], [0]>} : vector<2x64x16xbf16>, vector<2x16x4xbf16>, vector<2x64x4xf32> -> vector<2x64x4xf32>
    %68 = vector.extract_strided_slice %67 {offsets = [0, 0, 0], sizes = [2, 32, 4], strides = [1, 1, 1]} : vector<2x64x4xf32> to vector<2x32x4xf32>
    %69 = vector.extract_strided_slice %67 {offsets = [0, 32, 0], sizes = [2, 32, 4], strides = [1, 1, 1]} : vector<2x64x4xf32> to vector<2x32x4xf32>
    %70 = tpu.concatenate %68, %69 in 2 : vector<2x32x4xf32>, vector<2x32x4xf32> -> vector<2x32x8xf32>
    %71 = vector.shape_cast %70 : vector<2x32x8xf32> to vector<64x8xf32>
    %72 = arith.truncf %71 : vector<64x8xf32> to vector<64x8xbf16>
    %cst_75 = arith.constant dense<0.000000e+00> : vector<64x32xf32>
    %73 = tpu.matmul %72, %5, %cst_75 {dimension_numbers = #tpu.dot_dimension_numbers<[1], [0], [0], [1], [0, 0, 1, 1], [], []>} : vector<64x8xbf16>, vector<8x32xbf16>, vector<64x32xf32> -> vector<64x32xf32>
    %74 = vector.broadcast %33 : vector<1x32xf32> to vector<64x32xf32>
    %75 = arith.addf %73, %74 : vector<64x32xf32>
    %cst_76 = arith.constant 0.000000e+00 : f32
    %76 = vector.broadcast %cst_76 : f32 to vector<64x32xf32>
    %77 = arith.maximumf %75, %76 : vector<64x32xf32>
    %78 = arith.truncf %77 : vector<64x32xf32> to vector<64x32xbf16>
    %cst_77 = arith.constant dense<0.000000e+00> : vector<64x32xf32>
    %79 = tpu.matmul %78, %11, %cst_77 {dimension_numbers = #tpu.dot_dimension_numbers<[1], [0], [0], [1], [0, 0, 1, 1], [], []>} : vector<64x32xbf16>, vector<32x32xbf16>, vector<64x32xf32> -> vector<64x32xf32>
    %80 = vector.broadcast %35 : vector<1x32xf32> to vector<64x32xf32>
    %81 = arith.addf %79, %80 : vector<64x32xf32>
    %cst_78 = arith.constant 0.000000e+00 : f32
    %82 = vector.broadcast %cst_78 : f32 to vector<64x32xf32>
    %83 = arith.maximumf %81, %82 : vector<64x32xf32>
    %84 = arith.truncf %83 : vector<64x32xf32> to vector<64x32xbf16>
    %cst_79 = arith.constant dense<0.000000e+00> : vector<64x32xf32>
    %85 = tpu.matmul %84, %13, %cst_79 {dimension_numbers = #tpu.dot_dimension_numbers<[1], [0], [0], [1], [0, 0, 1, 1], [], []>} : vector<64x32xbf16>, vector<32x32xbf16>, vector<64x32xf32> -> vector<64x32xf32>
    %86 = vector.broadcast %37 : vector<1x32xf32> to vector<64x32xf32>
    %87 = arith.addf %85, %86 : vector<64x32xf32>
    %cst_80 = arith.constant 0.000000e+00 : f32
    %88 = vector.broadcast %cst_80 : f32 to vector<64x32xf32>
    %89 = arith.maximumf %87, %88 : vector<64x32xf32>
    %90 = arith.truncf %89 : vector<64x32xf32> to vector<64x32xbf16>
    %cst_81 = arith.constant dense<0.000000e+00> : vector<64x32xf32>
    %91 = tpu.matmul %90, %15, %cst_81 {dimension_numbers = #tpu.dot_dimension_numbers<[1], [0], [0], [1], [0, 0, 1, 1], [], []>} : vector<64x32xbf16>, vector<32x32xbf16>, vector<64x32xf32> -> vector<64x32xf32>
    %92 = vector.broadcast %39 : vector<1x32xf32> to vector<64x32xf32>
    %93 = arith.addf %91, %92 : vector<64x32xf32>
    %94 = arith.truncf %66 : vector<32x32xf32> to vector<32x32xbf16>
    %cst_82 = arith.constant dense<0.000000e+00> : vector<32x32xf32>
    %95 = tpu.matmul %94, %21, %cst_82 {dimension_numbers = #tpu.dot_dimension_numbers<[1], [0], [0], [1], [0, 0, 1, 1], [], []>} : vector<32x32xbf16>, vector<32x32xbf16>, vector<32x32xf32> -> vector<32x32xf32>
    %96 = vector.broadcast %41 : vector<1x32xf32> to vector<32x32xf32>
    %97 = arith.addf %95, %96 : vector<32x32xf32>
    %98 = vector.shape_cast %66 : vector<32x32xf32> to vector<2x16x32xf32>
    %99 = arith.truncf %98 : vector<2x16x32xf32> to vector<2x16x32xbf16>
    %cst_83 = arith.constant dense<0.000000e+00> : vector<2x64x32xf32>
    %100 = tpu.matmul %2, %99, %cst_83 {dimension_numbers = #tpu.dot_dimension_numbers<[2], [1], [1], [2], [0, 0, 0, 1, 1, 2], [0], [0]>} : vector<2x64x16xbf16>, vector<2x16x32xbf16>, vector<2x64x32xf32> -> vector<2x64x32xf32>
    %101 = vector.extract_strided_slice %100 {offsets = [0, 0, 0], sizes = [2, 32, 32], strides = [1, 1, 1]} : vector<2x64x32xf32> to vector<2x32x32xf32>
    %102 = vector.shape_cast %101 : vector<2x32x32xf32> to vector<64x32xf32>
    %103 = vector.extract_strided_slice %100 {offsets = [0, 32, 0], sizes = [2, 32, 32], strides = [1, 1, 1]} : vector<2x64x32xf32> to vector<2x32x32xf32>
    %104 = vector.shape_cast %103 : vector<2x32x32xf32> to vector<64x32xf32>
    %105 = arith.truncf %102 : vector<64x32xf32> to vector<64x32xbf16>
    %cst_84 = arith.constant dense<0.000000e+00> : vector<64x32xf32>
    %106 = tpu.matmul %105, %17, %cst_84 {dimension_numbers = #tpu.dot_dimension_numbers<[1], [0], [0], [1], [0, 0, 1, 1], [], []>} : vector<64x32xbf16>, vector<32x32xbf16>, vector<64x32xf32> -> vector<64x32xf32>
    %107 = arith.addf %93, %106 : vector<64x32xf32>
    %108 = arith.truncf %104 : vector<64x32xf32> to vector<64x32xbf16>
    %cst_85 = arith.constant dense<0.000000e+00> : vector<64x32xf32>
    %109 = tpu.matmul %108, %19, %cst_85 {dimension_numbers = #tpu.dot_dimension_numbers<[1], [0], [0], [1], [0, 0, 1, 1], [], []>} : vector<64x32xbf16>, vector<32x32xbf16>, vector<64x32xf32> -> vector<64x32xf32>
    %110 = arith.addf %107, %109 : vector<64x32xf32>
    %cst_86 = arith.constant 0.000000e+00 : f32
    %111 = vector.broadcast %cst_86 : f32 to vector<64x32xf32>
    %112 = arith.maximumf %110, %111 : vector<64x32xf32>
    %113 = vector.shape_cast %112 : vector<64x32xf32> to vector<2x32x32xf32>
    %114 = arith.truncf %113 : vector<2x32x32xf32> to vector<2x32x32xbf16>
    %cst_87 = arith.constant dense<0.000000e+00> : vector<2x16x32xf32>
    %115 = tpu.matmul %3, %114, %cst_87 {dimension_numbers = #tpu.dot_dimension_numbers<[2], [1], [1], [2], [0, 0, 0, 1, 1, 2], [0], [0]>} : vector<2x16x32xbf16>, vector<2x32x32xbf16>, vector<2x16x32xf32> -> vector<2x16x32xf32>
    %116 = vector.shape_cast %115 : vector<2x16x32xf32> to vector<32x32xf32>
    %117 = arith.truncf %116 : vector<32x32xf32> to vector<32x32xbf16>
    %cst_88 = arith.constant dense<0.000000e+00> : vector<32x32xf32>
    %118 = tpu.matmul %117, %23, %cst_88 {dimension_numbers = #tpu.dot_dimension_numbers<[1], [0], [0], [1], [0, 0, 1, 1], [], []>} : vector<32x32xbf16>, vector<32x32xbf16>, vector<32x32xf32> -> vector<32x32xf32>
    %119 = arith.addf %97, %118 : vector<32x32xf32>
    %120 = arith.addf %119, %66 : vector<32x32xf32>
    %cst_89 = arith.constant 0.000000e+00 : f32
    %121 = vector.broadcast %cst_89 : f32 to vector<32x32xf32>
    %122 = arith.maximumf %120, %121 : vector<32x32xf32>
    %123 = vector.shape_cast %122 : vector<32x32xf32> to vector<2x16x32xf32>
    %124 = arith.truncf %123 : vector<2x16x32xf32> to vector<2x16x32xbf16>
    %cst_90 = arith.constant dense<0.000000e+00> : vector<2x64x32xf32>
    %125 = tpu.matmul %2, %124, %cst_90 {dimension_numbers = #tpu.dot_dimension_numbers<[2], [1], [1], [2], [0, 0, 0, 1, 1, 2], [0], [0]>} : vector<2x64x16xbf16>, vector<2x16x32xbf16>, vector<2x64x32xf32> -> vector<2x64x32xf32>
    %126 = vector.extract_strided_slice %125 {offsets = [0, 0, 0], sizes = [2, 32, 32], strides = [1, 1, 1]} : vector<2x64x32xf32> to vector<2x32x32xf32>
    %127 = vector.shape_cast %126 : vector<2x32x32xf32> to vector<64x32xf32>
    %128 = vector.extract_strided_slice %125 {offsets = [0, 32, 0], sizes = [2, 32, 32], strides = [1, 1, 1]} : vector<2x64x32xf32> to vector<2x32x32xf32>
    %129 = vector.shape_cast %128 : vector<2x32x32xf32> to vector<64x32xf32>
    %130 = arith.truncf %127 : vector<64x32xf32> to vector<64x32xbf16>
    %cst_91 = arith.constant dense<0.000000e+00> : vector<64x32xf32>
    %131 = tpu.matmul %130, %17, %cst_91 {dimension_numbers = #tpu.dot_dimension_numbers<[1], [0], [0], [1], [0, 0, 1, 1], [], []>} : vector<64x32xbf16>, vector<32x32xbf16>, vector<64x32xf32> -> vector<64x32xf32>
    %132 = arith.addf %93, %131 : vector<64x32xf32>
    %133 = arith.truncf %129 : vector<64x32xf32> to vector<64x32xbf16>
    %cst_92 = arith.constant dense<0.000000e+00> : vector<64x32xf32>
    %134 = tpu.matmul %133, %19, %cst_92 {dimension_numbers = #tpu.dot_dimension_numbers<[1], [0], [0], [1], [0, 0, 1, 1], [], []>} : vector<64x32xbf16>, vector<32x32xbf16>, vector<64x32xf32> -> vector<64x32xf32>
    %135 = arith.addf %132, %134 : vector<64x32xf32>
    %cst_93 = arith.constant 0.000000e+00 : f32
    %136 = vector.broadcast %cst_93 : f32 to vector<64x32xf32>
    %137 = arith.maximumf %135, %136 : vector<64x32xf32>
    %138 = vector.shape_cast %137 : vector<64x32xf32> to vector<2x32x32xf32>
    %139 = arith.truncf %138 : vector<2x32x32xf32> to vector<2x32x32xbf16>
    %cst_94 = arith.constant dense<0.000000e+00> : vector<2x16x32xf32>
    %140 = tpu.matmul %3, %139, %cst_94 {dimension_numbers = #tpu.dot_dimension_numbers<[2], [1], [1], [2], [0, 0, 0, 1, 1, 2], [0], [0]>} : vector<2x16x32xbf16>, vector<2x32x32xbf16>, vector<2x16x32xf32> -> vector<2x16x32xf32>
    %141 = vector.shape_cast %140 : vector<2x16x32xf32> to vector<32x32xf32>
    %142 = arith.truncf %141 : vector<32x32xf32> to vector<32x32xbf16>
    %cst_95 = arith.constant dense<0.000000e+00> : vector<32x32xf32>
    %143 = tpu.matmul %142, %23, %cst_95 {dimension_numbers = #tpu.dot_dimension_numbers<[1], [0], [0], [1], [0, 0, 1, 1], [], []>} : vector<32x32xbf16>, vector<32x32xbf16>, vector<32x32xf32> -> vector<32x32xf32>
    %144 = arith.addf %97, %143 : vector<32x32xf32>
    %145 = arith.addf %144, %122 : vector<32x32xf32>
    %cst_96 = arith.constant 0.000000e+00 : f32
    %146 = vector.broadcast %cst_96 : f32 to vector<32x32xf32>
    %147 = arith.maximumf %145, %146 : vector<32x32xf32>
    %148 = tpu.concatenate %66, %147 in 1 : vector<32x32xf32>, vector<32x32xf32> -> vector<32x64xf32>
    %149 = arith.truncf %148 : vector<32x64xf32> to vector<32x64xbf16>
    %cst_97 = arith.constant dense<0.000000e+00> : vector<32x32xf32>
    %150 = tpu.matmul %149, %46, %cst_97 {dimension_numbers = #tpu.dot_dimension_numbers<[1], [0], [0], [1], [0, 0, 1, 1], [], []>} : vector<32x64xbf16>, vector<64x32xbf16>, vector<32x32xf32> -> vector<32x32xf32>
    %151 = vector.broadcast %43 : vector<1x32xf32> to vector<32x32xf32>
    %152 = arith.addf %150, %151 : vector<32x32xf32>
    %cst_98 = arith.constant 0.000000e+00 : f32
    %153 = vector.broadcast %cst_98 : f32 to vector<32x32xf32>
    %154 = arith.maximumf %152, %153 : vector<32x32xf32>
    %155 = arith.truncf %154 : vector<32x32xf32> to vector<32x32xbf16>
    %cst_99 = arith.constant dense<0.000000e+00> : vector<32x32xf32>
    %156 = tpu.matmul %155, %25, %cst_99 {dimension_numbers = #tpu.dot_dimension_numbers<[1], [0], [0], [1], [0, 0, 1, 1], [], []>} : vector<32x32xbf16>, vector<32x32xbf16>, vector<32x32xf32> -> vector<32x32xf32>
    %157 = vector.broadcast %45 : vector<1x32xf32> to vector<32x32xf32>
    %158 = arith.addf %156, %157 : vector<32x32xf32>
    %cst_100 = arith.constant 0.000000e+00 : f32
    %159 = vector.broadcast %cst_100 : f32 to vector<32x32xf32>
    %160 = arith.maximumf %158, %159 : vector<32x32xf32>
    %161 = arith.truncf %160 : vector<32x32xf32> to vector<32x32xbf16>
    %cst_101 = arith.constant dense<0.000000e+00> : vector<32x4xf32>
    %162 = tpu.matmul %161, %47, %cst_101 {dimension_numbers = #tpu.dot_dimension_numbers<[1], [0], [0], [1], [0, 0, 1, 1], [], []>} : vector<32x32xbf16>, vector<32x4xbf16>, vector<32x4xf32> -> vector<32x4xf32>
    %163 = vector.broadcast %48 : vector<1x4xf32> to vector<32x4xf32>
    %164 = arith.addf %162, %163 : vector<32x4xf32>
    %165 = vector.shape_cast %164 : vector<32x4xf32> to vector<2x16x4xf32>
    %c0_102 = arith.constant 0 : index
    %c0_103 = arith.constant 0 : index
    %c0_104 = arith.constant 0 : index
    %166 = vector.load %arg11[%c0_102, %c0_103, %c0_104] : memref<2x16x4xf32, #tpu.memory_space<vmem>>, vector<2x16x4xf32>
    tpu.vector_store %arg11[%c0_102, %c0_103, %c0_104], %165 {strides = array<i32>} : memref<2x16x4xf32, #tpu.memory_space<vmem>>, vector<2x16x4xf32>,
    return
  }
  func.func @transform_0(%arg0: i32) -> (i32, i32, i32) {
    %c0_i32 = arith.constant 0 : i32
    %c0_i32_0 = arith.constant 0 : i32
    %c0_i32_1 = arith.constant 0 : i32
    return %arg0, %c0_i32, %c0_i32_0 : i32, i32, i32
  }
  func.func @transform_1(%arg0: i32) -> (i32, i32, i32) {
    %c0_i32 = arith.constant 0 : i32
    %c0_i32_0 = arith.constant 0 : i32
    %c0_i32_1 = arith.constant 0 : i32
    return %arg0, %c0_i32, %c0_i32_0 : i32, i32, i32
  }
  func.func @transform_2(%arg0: i32) -> (i32, i32, i32) {
    %c0_i32 = arith.constant 0 : i32
    %c0_i32_0 = arith.constant 0 : i32
    %c0_i32_1 = arith.constant 0 : i32
    return %arg0, %c0_i32, %c0_i32_0 : i32, i32, i32
  }
  func.func @transform_3(%arg0: i32) -> (i32, i32) {
    %c0_i32 = arith.constant 0 : i32
    %c0_i32_0 = arith.constant 0 : i32
    %c0_i32_1 = arith.constant 0 : i32
    return %c0_i32, %c0_i32_0 : i32, i32
  }
  func.func @transform_4(%arg0: i32) -> (i32, i32) {
    %c0_i32 = arith.constant 0 : i32
    %c0_i32_0 = arith.constant 0 : i32
    %c0_i32_1 = arith.constant 0 : i32
    return %c0_i32, %c0_i32_0 : i32, i32
  }
  func.func @transform_5(%arg0: i32) -> (i32, i32, i32) {
    %c0_i32 = arith.constant 0 : i32
    %c0_i32_0 = arith.constant 0 : i32
    %c0_i32_1 = arith.constant 0 : i32
    %c0_i32_2 = arith.constant 0 : i32
    return %c0_i32, %c0_i32_0, %c0_i32_1 : i32, i32, i32
  }
  func.func @transform_6(%arg0: i32) -> (i32, i32, i32) {
    %c0_i32 = arith.constant 0 : i32
    %c0_i32_0 = arith.constant 0 : i32
    %c0_i32_1 = arith.constant 0 : i32
    %c0_i32_2 = arith.constant 0 : i32
    return %c0_i32, %c0_i32_0, %c0_i32_1 : i32, i32, i32
  }
  func.func @transform_7(%arg0: i32) -> (i32, i32) {
    %c0_i32 = arith.constant 0 : i32
    %c0_i32_0 = arith.constant 0 : i32
    %c0_i32_1 = arith.constant 0 : i32
    return %c0_i32, %c0_i32_0 : i32, i32
  }
  func.func @transform_8(%arg0: i32) -> (i32, i32) {
    %c0_i32 = arith.constant 0 : i32
    %c0_i32_0 = arith.constant 0 : i32
    %c0_i32_1 = arith.constant 0 : i32
    return %c0_i32, %c0_i32_0 : i32, i32
  }
  func.func @transform_9(%arg0: i32) -> (i32, i32) {
    %c0_i32 = arith.constant 0 : i32
    %c0_i32_0 = arith.constant 0 : i32
    %c0_i32_1 = arith.constant 0 : i32
    return %c0_i32, %c0_i32_0 : i32, i32
  }
  func.func @transform_10(%arg0: i32) -> (i32, i32, i32) {
    %c0_i32 = arith.constant 0 : i32
    %c0_i32_0 = arith.constant 0 : i32
    %c0_i32_1 = arith.constant 0 : i32
    return %arg0, %c0_i32, %c0_i32_0 : i32, i32, i32
  }
}

</mosaic_0001>

<bundles_post_ra>
// kernel: tpu_custom_call.1
= control target key start
LH: loop header
LB: loop body
LE: loop exit
PB: predicated region body
PF: predicated region fallthrough
CT: control target
= control target key end

     0   :  { %s3554_s13 = smov 0   ;;  %s4056_s0 = inlined_call_operand.vmem [shape: f32[8,16,4], index: 0, kind: input, shape index: {}]   ;;  %s4057_s1 = inlined_call_operand.vmem [shape: bf16[8,64,16], index: 1, kind: input, shape index: {}]   ;;  %s4058_s2 = inlined_call_operand.vmem [shape: bf16[8,16,32], index: 2, kind: input, shape index: {}]   ;;  %s4059_s3 = inlined_call_operand.vmem [shape: bf16[4,32], index: 3, kind: input, shape index: {}]   ;;  %s4060_s4 = inlined_call_operand.vmem [shape: bf16[8,32], index: 4, kind: input, shape index: {}]   ;;  %s4061_s5 = inlined_call_operand.vmem [shape: bf16[10,32,32], index: 5, kind: input, shape index: {}]   ;;  %s4062_s6 = inlined_call_operand.vmem [shape: f32[10,1,32], index: 6, kind: input, shape index: {}]   ;;  %s4063_s7 = inlined_call_operand.vmem [shape: bf16[64,32], index: 7, kind: input, shape index: {}]   ;;  %s4064_s8 = inlined_call_operand.vmem [shape: bf16[32,4], index: 8, kind: input, shape index: {}]   ;;  %s4065_s9 = inlined_call_operand.vmem [shape: f32[1,4], index: 9, kind: input, shape index: {}]   ;;  %s4066_s10 = inlined_call_operand.vmem [shape: f32[8,16,4], index: 10, kind: output, shape index: {}]  }
   0x1 LB: > { %s2828_s14 = sadd.s32 4294967295, %s3493_s13   ;;  %p2832_p0 = scmp.ge.s32.totalorder %s3493_s13, 1  ;;  %s3493_s13 = sphi %s3554_s13, %s20_s13  }
   0x2   : > { %p338_p1 = scmp.lt.s32.totalorder %s3493_s13, 5 }
   0x4   : > { %p339_p2 = pnand %p2832_p0, %p338_p1 }
   0x5   : > { %s2833_s17 = sshll.u32 (!%p339_p2), %s2828_s14, 1  ;;  %s3495_s28 = smov (!%p339_p2), 4  }
   0x6   : > { %342 = sbr.rel (%p339_p2) target bundleno = 3804 (0xedc), region = 60  ;;  %p391_p3 = scmp.lt.s32.totalorder (!%p339_p2), %s2833_s17, 7 }
   0xb   : > { %v445_v0 = vld [vmem:[%s4059_s3] sm:$0x3]  ;;  %vm541_vm0 = vcmask 1041408   ;;  %s4068_s17 = smov (!%p391_p3, %s2833_s17), 7  ;;  %vm534_vm1 = vcmask 31744   ;;  %v3451_v8 = vld [vmem:[%s4061_s5 + $0x8] sm:$0xff]  }
   0xc   : > { %3407 = vmatprep.subr.msk.bf16.mxu0 %vm541_vm0, %v445_v0  ;;  %v543_v1 = vsel %vm541_vm0, %v445_v0, 0  ;;  %s3017_s18 = sshll.u32 %s4068_s17, 4  ;;  %s3018_s19 = sshll.u32 %s4068_s17, 5  ;;  %3153 = vmatprep.subr.bf16.mxu1 %v3451_v8  ;;  %v3452_v9 = vld [vmem:[%s4061_s5] sm:$0xff]   ;;  %vm618_vm2 = vcmask 261120   ;;  %vm777_vm3 = vcmask 130048  }
   0xd   : > { %3148 = vmatpush3.bf16.msra.mxu0 %v543_v1  ;;  %s395_s22 = scalar_lea.vmem %s4056_s0, %s3017_s18  ;;  %s3577_s25 = scalar_lea.vmem %s4057_s1, %s3018_s19  ;;  %3154 = vmatpush3.bf16.msra.mxu1 %v3451_v8  ;;  %v2890_v12 = vld [vmem:[%s4062_s6] ss:$0 sm:$0xff]  ;;  %v3457_v29 = vld [vmem:[%s4061_s5 + $0x18] sm:$0xff]   ;;  %v3458_v30 = vld [vmem:[%s4061_s5 + $0x10] sm:$0xff]   ;;  %vm1015_vm4 = vcmask 1043456   ;;  %vm1002_vm5 = vcmask 64512  }
   0xe   : > { %v419_v2 = vld [vmem:[%s395_s22] sm:$0xff]  ;;  %v420_v3 = vld [vmem:[%s395_s22 + $0x8] sm:$0xff]  ;;  %v421_v4 = vld [vmem:[%s395_s22 + $0x10] sm:$0xff]  ;;  %s3019_s26 = sshll.u32 %s4068_s17, 3  ;;  %3155 = vmatprep.subr.bf16.mxu1 %v3452_v9  ;;  %3161 = vmatprep.subr.bf16.mxu0 %v3457_v29  ;;  %vm3497_vm6 = vmmov 0   ;;  %vm2528_vm7 = vcmask 523264  }
   0xf   : > { %v423_v5 = vpack.c.bf16 %v420_v3, %v419_v2  ;;  %v422_v6 = vld [vmem:[%s395_s22 + $0x18] sm:$0xff]  ;;  %s3588_s29 = scalar_lea.vmem %s4058_s2, %s3019_s26  ;;  %v3600_v24 = vld [vmem:[%s3577_s25] sm:$0xff]   ;;  %v3607_v26 = vld [vmem:[%s3577_s25 + $0x8] sm:$0xff]  }
  0x10   : > { %v3580_v7 = vpack.c.bf16 %v422_v6, %v421_v4  ;;  %v3610_v27 = vld [vmem:[%s3577_s25 + $0x10] sm:$0xff]   ;;  %v3617_v28 = vld [vmem:[%s3577_s25 + $0x18] sm:$0xff]   ;;  %v2893_v33 = vld [vmem:[%s4062_s6 + $0x1] ss:$0 sm:$0xff] }
  0x11   : > { %3149 = vmatprep.mubr.msk.bf16.mxu0 %vm534_vm1, %v423_v5  ;;  %3156 = vmatpush3.bf16.msra.mxu1 %v3452_v9  ;;  %v3632_v47 = vld [vmem:[%s3577_s25 + $0x20] sm:$0xff]   ;;  %v3643_v55 = vld [vmem:[%s3577_s25 + $0x28] sm:$0xff]   ;;  %v3646_v56 = vld [vmem:[%s3577_s25 + $0x30] sm:$0xff]  }
  0x12   : > { %3150 = vmatmul.mubr.msk.bf16.vlgmr.msra.gmra.mxu0 %vm534_vm1, %v3580_v7  ;;  %3169 = vmatprep.subr.bf16.mxu1 %v423_v5  ;;  %v446_v52 = vld [vmem:[%s4060_s4] sm:$0xf]  ;;  %v3654_v61 = vld [vmem:[%s3577_s25 + $0x38] sm:$0xff]  }
  0x13   : > { %3162 = vmatpush3.bf16.msra.mxu0 %v3457_v29  ;;  %v1017_v53 = vsel %vm1015_vm4, %v446_v52, 0  ;;  %v3465_v29 = vld [vmem:[%s4061_s5 + $0x48] sm:$0xff]  }
  0x14   : > { %3163 = vmatprep.subr.bf16.mxu0 %v3458_v30 }
  0x17   : > { %3164 = vmatpush3.bf16.msra.mxu0 %v3458_v30 }
  0x18   : > { %3179 = vmatprep.subr.bf16.mxu0 %v3580_v7 }
  0xd2   : > { %v3151_v10 = vpop.f32.mrf.mxu0 }
  0xd3   : > { %v588_v16 = vadd.f32 %v3151_v10, %v2890_v12  ;;  %v2898_v10 = vld [vmem:[%s4062_s6 + $0x2] ss:$0 sm:$0xff] }
  0xd4   : > { %v579_v11 = vpop.f32.mrf.mxu0 }
  0xd5   : > { %v580_v14 = vadd.f32 %v2890_v12, %v579_v11  ;;  %v596_v22 = vmax.f32 %v588_v16, 0.0 }
  0xd6   : > { %v3152_v13 = vpop.f32.mrf.mxu0 }
  0xd7   : > { %v591_v15 = vadd.f32 %v3152_v13, %v2890_v12  ;;  %v594_v20 = vmax.f32 %v580_v14, 0.0 }
  0xd8   : > { %v582_v17 = vpop.f32.mrf.mxu0 }
  0xd9   : > { %v583_v18 = vadd.f32 %v2890_v12, %v582_v17  ;;  %v597_v19 = vmax.f32 %v591_v15, 0.0 }
  0xdb   : > { %v595_v21 = vmax.f32 %v583_v18, 0.0  ;;  %v599_v25 = vpack.c.bf16 %v597_v19, %v596_v22  ;;  %v3463_v19 = vld [vmem:[%s4061_s5 + $0x28] sm:$0xff]   ;;  %v3464_v22 = vld [vmem:[%s4061_s5 + $0x20] sm:$0xff]  }
  0xdd   : > { %v598_v23 = vpack.c.bf16 %v595_v21, %v594_v20 }
  0xdf   : > { %3157 = vmatprep.mubr.msk.bf16.mxu1 %vm618_vm2, %v598_v23 }
  0xe0   : > { %3158 = vmatmul.mubr.msk.bf16.vlgmr.msra.gmra.mxu1 %vm618_vm2, %v599_v25 }
  0xe1   : > { %3170 = vmatpush3.bf16.msra.mxu1 %v423_v5  ;;  %3171 = vmatprep.mubr.msk.bf16.mxu1 %vm777_vm3, %v3600_v24 }
  0xe2   : > { %3408 = vmatprep.subr.msk.bf16.mxu1 %vm1015_vm4, %v446_v52 }
  0xe8   : > { %3172 = vmatmul.mubr.msk.bf16.vlgmr.msra.gmra.mxu1 %vm777_vm3, %v3607_v26 }
  0xe9   : > { %3175 = vmatprep.mubr.msk.bf16.mxu1 %vm777_vm3, %v3610_v27  ;;  %3190 = vmatpush3.bf16.msra.mxu1 %v1017_v53 }
  0xf0   : > { %3176 = vmatmul.mubr.msk.bf16.gmra.mxu1 %vm777_vm3, %v3617_v28 }
 0x1a0   : > { %v3159_v31 = vpop.f32.mrf.mxu1 }
 0x1a1   : > { %v668_v37 = vadd.f32 %v3159_v31, %v2893_v33 }
 0x1a2   : > { %v659_v32 = vpop.f32.mrf.mxu1 }
 0x1a3   : > { %v660_v35 = vadd.f32 %v2893_v33, %v659_v32  ;;  %v676_v44 = vmax.f32 %v668_v37, 0.0 }
 0x1a4   : > { %v3160_v34 = vpop.f32.mrf.mxu1 }
 0x1a5   : > { %v671_v36 = vadd.f32 %v3160_v34, %v2893_v33  ;;  %v674_v42 = vmax.f32 %v660_v35, 0.0  ;;  %v3686_v34 = vld [vmem:[%s4062_s6 + $0x3] ss:$0 sm:$0xff] }
 0x1a6   : > { %v662_v38 = vpop.f32.mrf.mxu1 }
 0x1a7   : > { %v663_v39 = vadd.f32 %v2893_v33, %v662_v38  ;;  %v677_v40 = vmax.f32 %v671_v36, 0.0 }
 0x1a8   : > { %v3173_v41 = vpop.f32.mrf.mxu1 }
 0x1a9   : > { %v675_v43 = vmax.f32 %v663_v39, 0.0  ;;  %v679_v48 = vpack.c.bf16 %v677_v40, %v676_v44 }
 0x1aa   : > { %v824_v45 = vpop.f32.mrf.mxu1 }
 0x1ab   : > { %v678_v46 = vpack.c.bf16 %v675_v43, %v674_v42 }
 0x1ac   : > { %v3174_v49 = vpop.f32.mrf.mxu1 }
 0x1ad   : > { %3165 = vmatprep.mubr.msk.bf16.mxu0 %vm618_vm2, %v678_v46 }
 0x1ae   : > { %3166 = vmatmul.mubr.msk.bf16.vlgmr.msra.gmra.mxu0 %vm618_vm2, %v679_v48  ;;  %v827_v50 = vpop.f32.mrf.mxu1 }
 0x1af   : > { %3180 = vmatpush3.bf16.msra.mxu0 %v3580_v7  ;;  %3181 = vmatprep.mubr.msk.bf16.mxu0 %vm777_vm3, %v3632_v47 }
 0x1b0   : > { %v3177_v51 = vpop.f32.mrf.mxu1  ;;  %3199 = vmatprep.subr.bf16.mxu0 %v3463_v19 }
 0x1b2   : > { %v840_v54 = vpop.f32.mrf.mxu1 }
 0x1b4   : > { %v3178_v57 = vpop.f32.mrf.mxu1 }
 0x1b5   : > { %v3426_v60 = vpack.i.bf16 %v3178_v57, %v3177_v51 }
 0x1b6   : > { %v843_v58 = vpop.f32.mrf.mxu1  ;;  %3182 = vmatmul.mubr.msk.bf16.vlgmr.msra.gmra.mxu0 %vm777_vm3, %v3643_v55 }
 0x1b7   : > { %v3421_v59 = vpack.i.bf16 %v843_v58, %v840_v54  ;;  %3185 = vmatprep.mubr.msk.bf16.mxu0 %vm777_vm3, %v3646_v56  ;;  %3200 = vmatpush3.bf16.msra.mxu0 %v3463_v19 }
 0x1b8   : > { %3201 = vmatprep.subr.bf16.mxu0 %v3464_v22 }
 0x1b9   : > { %3422 = vrot.lane.b32.xlu0 %v3421_v59, %s3495_s28 }
 0x1bb   : > { %3202 = vmatpush3.bf16.msra.mxu0 %v3464_v22 }
 0x1bc   : > { %3223 = vmatprep.subr.bf16.mxu0 %v3465_v29 }
 0x1bd   : > { %3427 = vrot.lane.b32.xlu0 %v3426_v60, %s3495_s28 }
 0x1be   : > { %3186 = vmatmul.mubr.msk.bf16.gmra.mxu0 %vm777_vm3, %v3654_v61 }
 0x22b   : > { %v3423_v62 = vpop.permute.xlu0 %3422 }
 0x22c   : > { %v3425_v63 = vunpack.i.h.bf16 %v3423_v62  ;;  %v3424_v0 = vunpack.i.l.bf16 %v3423_v62 }
 0x22e   : > { %v985_v1 = vsel %vm534_vm1, %v827_v50, %v3425_v63  ;;  %v984_v2 = vsel %vm534_vm1, %v824_v45, %v3424_v0 }
 0x22f   : > { %v992_v3 = vpack.c.bf16 %v985_v1, %v984_v2  ;;  %v3428_v4 = vpop.permute.xlu0 %3427 }
 0x230   : > { %v3430_v5 = vunpack.i.h.bf16 %v3428_v4  ;;  %v3429_v6 = vunpack.i.l.bf16 %v3428_v4 }
 0x231   : > { %3191 = vmatprep.mubr.msk.bf16.mxu1 %vm1002_vm5, %v992_v3  ;;  %v3466_v3 = vld [vmem:[%s4061_s5 + $0x40] sm:$0xff]  }
 0x232   : > { %v987_v7 = vsel %vm534_vm1, %v3174_v49, %v3430_v5  ;;  %v986_v8 = vsel %vm534_vm1, %v3173_v41, %v3429_v6 }
 0x233   : > { %v993_v9 = vpack.c.bf16 %v987_v7, %v986_v8  ;;  %v3467_v7 = vld [vmem:[%s4061_s5 + $0x38] sm:$0xff]   ;;  %v3468_v8 = vld [vmem:[%s4061_s5 + $0x30] sm:$0xff]  }
 0x234   : > { %3211 = vmatprep.subr.bf16.mxu1 %v3467_v7 }
 0x235   : > { %3192 = vmatmul.mubr.msk.bf16.vlgmr.msra.gmra.mxu1 %vm1002_vm5, %v993_v9  ;;  %v3469_v9 = vld [vmem:[%s4061_s5 + $0x78] sm:$0xff]  }
 0x236   : > { %3212 = vmatpush3.bf16.msra.mxu1 %v3467_v7 }
 0x237   : > { %3213 = vmatprep.subr.bf16.mxu1 %v3468_v8 }
 0x23a   : > { %3214 = vmatpush3.bf16.msra.mxu1 %v3468_v8 }
 0x23b   : > { %3235 = vmatprep.subr.bf16.mxu1 %v3469_v9 }
 0x26e   : > { %v3167_v11 = vpop.f32.mrf.mxu0 }
 0x26f   : > { %v3668_v12 = vadd.f32 %v3167_v11, %v2898_v10 }
 0x270   : > { %v738_v13 = vpop.f32.mrf.mxu0 }
 0x271   : > { %v739_v1 = vadd.f32 %v2898_v10, %v738_v13 }
 0x272   : > { %v3168_v14 = vpop.f32.mrf.mxu0 }
 0x273   : > { %v3670_v15 = vadd.f32 %v3168_v14, %v2898_v10  ;;  %v3705_v5 = vmax.f32 %v739_v1, 0.0 }
 0x274   : > { %v741_v16 = vpop.f32.mrf.mxu0 }
 0x275   : > { %v742_v59 = vadd.f32 %v2898_v10, %v741_v16  ;;  %v2924_v10 = vld [vmem:[%s4062_s6 + $0x4] ss:$0 sm:$0xff] }
 0x276   : > { %v3183_v17 = vpop.f32.mrf.mxu0 }
 0x277   : > { %v3701_v4 = vmax.f32 %v742_v59, 0.0 }
 0x278   : > { %v921_v18 = vpop.f32.mrf.mxu0 }
 0x279   : > { %v3709_v6 = vpack.c.bf16 %v3701_v4, %v3705_v5 }
 0x27a   : > { %v3184_v20 = vpop.f32.mrf.mxu0 }
 0x27c   : > { %v924_v21 = vpop.f32.mrf.mxu0 }
 0x27e   : > { %v3187_v23 = vpop.f32.mrf.mxu0 }
 0x280   : > { %v937_v25 = vpop.f32.mrf.mxu0 }
 0x282   : > { %v3188_v30 = vpop.f32.mrf.mxu0 }
 0x283   : > { %v3436_v33 = vpack.i.bf16 %v3188_v30, %v3187_v23 }
 0x284   : > { %v940_v31 = vpop.f32.mrf.mxu0 }
 0x285   : > { %v3431_v32 = vpack.i.bf16 %v940_v31, %v937_v25 }
 0x287   : > { %3432 = vrot.lane.b32.xlu1 %v3431_v32, %s3495_s28 }
 0x28b   : > { %3437 = vrot.lane.b32.xlu1 %v3436_v33, %s3495_s28  ;;  %s3498_s28 = smov 32  }
 0x2f5   : > { %v3193_v35 = vpop.f32.mrf.mxu1 }
 0x2f6   : > { %v1062_v36 = vadd.f32 %v3193_v35, %v3686_v34 }
 0x2f7   : > { %v1053_v37 = vpop.f32.mrf.mxu1 }
 0x2f8   : > { %v1054_v38 = vadd.f32 %v3686_v34, %v1053_v37  ;;  %v1086_v44 = vmax.f32 %v1062_v36, 0.0 }
 0x2f9   : > { %v3194_v39 = vpop.f32.mrf.mxu1  ;;  %v3433_v40 = vpop.permute.xlu1 %3432 }
 0x2fa   : > { %v1065_v41 = vadd.f32 %v3194_v39, %v3686_v34  ;;  %v3435_v42 = vunpack.i.h.bf16 %v3433_v40  ;;  %v3434_v43 = vunpack.i.l.bf16 %v3433_v40  ;;  %v1084_v45 = vmax.f32 %v1054_v38, 0.0 }
 0x2fb   : > { %v1056_v46 = vpop.f32.mrf.mxu1 }
 0x2fc   : > { %v1087_v48 = vmax.f32 %v1065_v41, 0.0  ;;  %v989_v49 = vsel %vm534_vm1, %v924_v21, %v3435_v42  ;;  %v988_v50 = vsel %vm534_vm1, %v921_v18, %v3434_v43  ;;  %v1057_v51 = vadd.f32 %v3686_v34, %v1056_v46  ;;  %v3470_v46 = vld [vmem:[%s4061_s5 + $0x70] sm:$0xff]  }
 0x2fd   : > { %v994_v52 = vpack.c.bf16 %v989_v49, %v988_v50  ;;  %v3438_v53 = vpop.permute.xlu1 %3437  ;;  %v2931_v50 = vld [vmem:[%s4062_s6 + $0x5] ss:$0 sm:$0xff] }
 0x2fe   : > { %v1085_v54 = vmax.f32 %v1057_v51, 0.0  ;;  %v3440_v57 = vunpack.i.h.bf16 %v3438_v53  ;;  %v3439_v58 = vunpack.i.l.bf16 %v3438_v53  ;;  %v1093_v60 = vpack.c.bf16 %v1087_v48, %v1086_v44 }
 0x2ff   : > { %3195 = vmatprep.mubr.msk.bf16.mxu1 %vm1002_vm5, %v994_v52  ;;  %v3739_v48 = vmax.f32 %v3668_v12, 0.0 }
 0x300   : > { %v1092_v62 = vpack.c.bf16 %v1085_v54, %v1084_v45  ;;  %v991_v63 = vsel %vm534_vm1, %v3184_v20, %v3440_v57  ;;  %v990_v0 = vsel %vm534_vm1, %v3183_v17, %v3439_v58 }
 0x301   : > { %v995_v2 = vpack.c.bf16 %v991_v63, %v990_v0 }
 0x302   : > { %3203 = vmatprep.mubr.msk.bf16.mxu0 %vm618_vm2, %v1092_v62 }
 0x303   : > { %3196 = vmatmul.mubr.msk.bf16.gmra.mxu1 %vm1002_vm5, %v995_v2  ;;  %3204 = vmatmul.mubr.msk.bf16.vlgmr.msra.gmra.mxu0 %vm618_vm2, %v1093_v60 }
 0x304   : > { %3224 = vmatpush3.bf16.msra.mxu0 %v3465_v29 }
 0x305   : > { %3225 = vmatprep.subr.bf16.mxu0 %v3466_v3 }
 0x308   : > { %3226 = vmatpush3.bf16.msra.mxu0 %v3466_v3 }
 0x309   : > { %3243 = vmatprep.subr.bf16.mxu0 %v3709_v6 }
 0x3c3   : > { %v3197_v11 = vpop.f32.mrf.mxu1  ;;  %v3205_v13 = vpop.f32.mrf.mxu0 }
 0x3c4   : > { %v1169_v14 = vadd.f32 %v3205_v13, %v2924_v10  ;;  %v1078_v25 = vadd.f32 %v3197_v11, %v3686_v34 }
 0x3c5   : > { %v1069_v16 = vpop.f32.mrf.mxu1  ;;  %v1160_v17 = vpop.f32.mrf.mxu0 }
 0x3c6   : > { %v1161_v18 = vadd.f32 %v2924_v10, %v1160_v17  ;;  %v1070_v21 = vadd.f32 %v3686_v34, %v1069_v16  ;;  %v1193_v29 = vmax.f32 %v1169_v14, 0.0  ;;  %v1090_v41 = vmax.f32 %v1078_v25, 0.0 }
 0x3c7   : > { %v3198_v19 = vpop.f32.mrf.mxu1  ;;  %v3206_v20 = vpop.f32.mrf.mxu0 }
 0x3c8   : > { %v1081_v22 = vadd.f32 %v3198_v19, %v3686_v34  ;;  %v1172_v23 = vadd.f32 %v3206_v20, %v2924_v10  ;;  %v1191_v32 = vmax.f32 %v1161_v18, 0.0  ;;  %v1088_v38 = vmax.f32 %v1070_v21, 0.0 }
 0x3c9   : > { %v1072_v30 = vpop.f32.mrf.mxu1  ;;  %v1163_v31 = vpop.f32.mrf.mxu0 }
 0x3ca   : > { %v1194_v33 = vmax.f32 %v1172_v23, 0.0  ;;  %v1073_v35 = vadd.f32 %v3686_v34, %v1072_v30  ;;  %v1164_v36 = vadd.f32 %v2924_v10, %v1163_v31  ;;  %v1091_v37 = vmax.f32 %v1081_v22, 0.0 }
 0x3cb   : > { %v3734_v34 = vmax.f32 %v3670_v15, 0.0 }
 0x3cc   : > { %v1089_v39 = vmax.f32 %v1073_v35, 0.0  ;;  %v1192_v40 = vmax.f32 %v1164_v36, 0.0  ;;  %v1200_v42 = vpack.c.bf16 %v1194_v33, %v1193_v29  ;;  %v1095_v45 = vpack.c.bf16 %v1091_v37, %v1090_v41  ;;  %v3789_v41 = vld [vmem:[%s4061_s5 + $0x68] sm:$0xff]  }
 0x3cd   : > { %v1406_v49 = vpack.c.bf16 %v3734_v34, %v3739_v48 }
 0x3ce   : > { %v1094_v43 = vpack.c.bf16 %v1089_v39, %v1088_v38  ;;  %v1199_v44 = vpack.c.bf16 %v1192_v40, %v1191_v32  ;;  %v3775_v39 = vld [vmem:[%s4061_s5 + $0x58] sm:$0xff]   ;;  %v3782_v40 = vld [vmem:[%s4061_s5 + $0x50] sm:$0xff]  }
 0x3d0   : > { %3207 = vmatprep.mubr.msk.bf16.mxu0 %vm618_vm2, %v1094_v43  ;;  %3215 = vmatprep.mubr.msk.bf16.mxu1 %vm618_vm2, %v1199_v44 }
 0x3d1   : > { %3208 = vmatmul.mubr.msk.bf16.gmra.mxu0 %vm618_vm2, %v1095_v45  ;;  %3216 = vmatmul.mubr.msk.bf16.vlgmr.msra.gmra.mxu1 %vm618_vm2, %v1200_v42  ;;  %v3796_v42 = vld [vmem:[%s4061_s5 + $0x60] sm:$0xff]  }
 0x3d2   : > { %3236 = vmatpush3.bf16.msra.mxu1 %v3469_v9 }
 0x3d3   : > { %3237 = vmatprep.subr.bf16.mxu1 %v3470_v46 }
 0x3d6   : > { %3238 = vmatpush3.bf16.msra.mxu1 %v3470_v46 }
 0x3d7   : > { %3253 = vmatprep.subr.bf16.mxu1 %v1406_v49 }
 0x491   : > { %v3209_v15 = vpop.f32.mrf.mxu0  ;;  %v3217_v51 = vpop.f32.mrf.mxu1 }
 0x492   : > { %v1276_v52 = vadd.f32 %v3217_v51, %v2931_v50  ;;  %v1185_v63 = vadd.f32 %v3209_v15, %v2924_v10 }
 0x493   : > { %v1176_v53 = vpop.f32.mrf.mxu0  ;;  %v1267_v54 = vpop.f32.mrf.mxu1 }
 0x494   : > { %v1268_v57 = vadd.f32 %v2931_v50, %v1267_v54  ;;  %v1177_v12 = vadd.f32 %v2924_v10, %v1176_v53  ;;  %v1300_v0 = vmax.f32 %v1276_v52, 0.0  ;;  %v1197_v17 = vmax.f32 %v1185_v63, 0.0 }
 0x495   : > { %v3210_v58 = vpop.f32.mrf.mxu0  ;;  %v3218_v59 = vpop.f32.mrf.mxu1 }
 0x496   : > { %v1188_v60 = vadd.f32 %v3210_v58, %v2924_v10  ;;  %v1279_v62 = vadd.f32 %v3218_v59, %v2931_v50  ;;  %v1298_v3 = vmax.f32 %v1268_v57, 0.0  ;;  %v1195_v13 = vmax.f32 %v1177_v12, 0.0 }
 0x497   : > { %v1179_v1 = vpop.f32.mrf.mxu0  ;;  %v1270_v2 = vpop.f32.mrf.mxu1 }
 0x498   : > { %v1301_v7 = vmax.f32 %v1279_v62, 0.0  ;;  %v1180_v8 = vadd.f32 %v2924_v10, %v1179_v1  ;;  %v1271_v9 = vadd.f32 %v2931_v50, %v1270_v2  ;;  %v1198_v11 = vmax.f32 %v1188_v60, 0.0 }
 0x49a   : > { %v1196_v14 = vmax.f32 %v1180_v8, 0.0  ;;  %v1299_v16 = vmax.f32 %v1271_v9, 0.0  ;;  %v1307_v18 = vpack.c.bf16 %v1301_v7, %v1300_v0  ;;  %v1202_v21 = vpack.c.bf16 %v1198_v11, %v1197_v17 }
 0x49c   : > { %v1201_v19 = vpack.c.bf16 %v1196_v14, %v1195_v13  ;;  %v1306_v20 = vpack.c.bf16 %v1299_v16, %v1298_v3 }
 0x49e   : > { %3219 = vmatprep.mubr.msk.bf16.mxu1 %vm618_vm2, %v1201_v19  ;;  %3227 = vmatprep.mubr.msk.bf16.mxu0 %vm618_vm2, %v1306_v20 }
 0x49f   : > { %3220 = vmatmul.mubr.msk.bf16.gmra.mxu1 %vm618_vm2, %v1202_v21  ;;  %3228 = vmatmul.mubr.msk.bf16.vlgmr.msra.gmra.mxu0 %vm618_vm2, %v1307_v18 }
 0x4a0   : > { %3244 = vmatpush3.bf16.msra.mxu0 %v3709_v6  ;;  %3239 = vmatprep.mubr.msk.bf16.mxu1 %vm618_vm2, %v3709_v6 }
 0x4a1   : > { %3263 = vmatprep.subr.bf16.mxu0 %v3775_v39 }
 0x4a7   : > { %3240 = vmatmul.mubr.msk.bf16.vlgmr.msra.gmra.mxu1 %vm618_vm2, %v1406_v49 }
 0x4a8   : > { %3254 = vmatpush3.bf16.msra.mxu1 %v1406_v49  ;;  %3255 = vmatprep.mubr.msk.bf16.mxu1 %vm777_vm3, %v3632_v47 }
 0x4a9   : > { %3275 = vmatprep.subr.bf16.mxu1 %v3789_v41 }
 0x4af   : > { %3256 = vmatmul.mubr.msk.bf16.vlgmr.msra.gmra.mxu1 %vm777_vm3, %v3643_v55 }
 0x4b0   : > { %3259 = vmatprep.mubr.msk.bf16.mxu1 %vm777_vm3, %v3646_v56  ;;  %3276 = vmatpush3.bf16.msra.mxu1 %v3789_v41 }
 0x4b1   : > { %3277 = vmatprep.subr.bf16.mxu1 %v3796_v42 }
 0x4b4   : > { %3278 = vmatpush3.bf16.msra.mxu1 %v3796_v42 }
 0x4b7   : > { %3260 = vmatmul.mubr.msk.bf16.gmra.mxu1 %vm777_vm3, %v3654_v61 }
 0x55f   : > { %v3221_v10 = vpop.f32.mrf.mxu1  ;;  %v3229_v46 = vpop.f32.mrf.mxu0 }
 0x560   : > { %v1292_v29 = vadd.f32 %v3221_v10, %v2931_v50 }
 0x561   : > { %v1283_v22 = vpop.f32.mrf.mxu1 }
 0x562   : > { %v1284_v25 = vadd.f32 %v2931_v50, %v1283_v22  ;;  %v1304_v36 = vmax.f32 %v1292_v29, 0.0  ;;  %v2938_v29 = vld [vmem:[%s4062_s6 + $0x6] ss:$0 sm:$0xff] }
 0x563   : > { %v3222_v23 = vpop.f32.mrf.mxu1 }
 0x564   : > { %v1295_v6 = vadd.f32 %v3222_v23, %v2931_v50  ;;  %v1302_v33 = vmax.f32 %v1284_v25, 0.0  ;;  %v3496_v23 = vmov 0.0  }
 0x565   : > { %v1286_v30 = vpop.f32.mrf.mxu1  ;;  %3295 = vmatprep.subr.bf16.mxu1 %v3496_v23 }
 0x566   : > { %v1287_v31 = vadd.f32 %v2931_v50, %v1286_v30  ;;  %v1305_v32 = vmax.f32 %v1295_v6, 0.0  ;;  %v1374_v50 = vpop.f32.mrf.mxu0 }
 0x567   : > { %v3800_v43 = vpop.f32.mrf.mxu1 }
 0x568   : > { %v1303_v35 = vmax.f32 %v1287_v31, 0.0  ;;  %v1309_v38 = vpack.c.bf16 %v1305_v32, %v1304_v36  ;;  %v3230_v51 = vpop.f32.mrf.mxu0  ;;  %v3831_v32 = vadd.f32 %v3229_v46, %v2938_v29 }
 0x569   : > { %v3802_v44 = vpop.f32.mrf.mxu1  ;;  %v3833_v36 = vadd.f32 %v3230_v51, %v2938_v29 }
 0x56a   : > { %v1308_v37 = vpack.c.bf16 %v1303_v35, %v1302_v33  ;;  %v1377_v53 = vpop.f32.mrf.mxu0 }
 0x56b   : > { %v3804_v45 = vpop.f32.mrf.mxu1 }
 0x56c   : > { %3231 = vmatprep.mubr.msk.bf16.mxu0 %vm618_vm2, %v1308_v37 }
 0x56d   : > { %3232 = vmatmul.mubr.msk.bf16.gmra.mxu0 %vm618_vm2, %v1309_v38  ;;  %v3806_v49 = vpop.f32.mrf.mxu1 }
 0x56e   : > { %3245 = vmatprep.mubr.msk.bf16.mxu0 %vm777_vm3, %v3600_v24 }
 0x56f   : > { %v3257_v15 = vpop.f32.mrf.mxu1 }
 0x571   : > { %v1579_v52 = vpop.f32.mrf.mxu1 }
 0x573   : > { %v3258_v57 = vpop.f32.mrf.mxu1 }
 0x574   : > { %v1613_v21 = vpack.c.bf16 %v3258_v57, %v3257_v15  ;;  %v3838_v57 = vadd.f32 %v2938_v29, %v1377_v53 }
 0x575   : > { %3246 = vmatmul.mubr.msk.bf16.vlgmr.msra.gmra.mxu0 %vm777_vm3, %v3607_v26  ;;  %v1582_v12 = vpop.f32.mrf.mxu1 }
 0x576   : > { %3249 = vmatprep.mubr.msk.bf16.mxu0 %vm777_vm3, %v3610_v27  ;;  %3264 = vmatpush3.bf16.msra.mxu0 %v3775_v39  ;;  %v1612_v8 = vpack.c.bf16 %v1582_v12, %v1579_v52  ;;  %v3836_v52 = vadd.f32 %v2938_v29, %v1374_v50 }
 0x577   : > { %3265 = vmatprep.subr.bf16.mxu0 %v3782_v40  ;;  %v3261_v63 = vpop.f32.mrf.mxu1 }
 0x579   : > { %v1595_v2 = vpop.f32.mrf.mxu1 }
 0x57a   : > { %3266 = vmatpush3.bf16.msra.mxu0 %v3782_v40 }
 0x57b   : > { %v3262_v13 = vpop.f32.mrf.mxu1  ;;  %3287 = vmatprep.subr.bf16.mxu0 %v3496_v23 }
 0x57c   : > { %v1714_v22 = vpack.c.bf16 %v3262_v13, %v3261_v63 }
 0x57d   : > { %3250 = vmatmul.mubr.msk.bf16.gmra.mxu0 %vm777_vm3, %v3617_v28  ;;  %v1598_v17 = vpop.f32.mrf.mxu1 }
 0x57e   : > { %v1713_v20 = vpack.c.bf16 %v1598_v17, %v1595_v2 }
 0x62d   : > { %v3233_v54 = vpop.f32.mrf.mxu0 }
 0x62e   : > { %v3843_v2 = vadd.f32 %v3233_v54, %v2938_v29 }
 0x62f   : > { %v3808_v58 = vpop.f32.mrf.mxu0 }
 0x630   : > { %v3850_v17 = vadd.f32 %v2938_v29, %v3808_v58 }
 0x631   : > { %v3810_v59 = vpop.f32.mrf.mxu0 }
 0x632   : > { %v3846_v53 = vadd.f32 %v3810_v59, %v2938_v29 }
 0x633   : > { %v3812_v60 = vpop.f32.mrf.mxu0 }
 0x635   : > { %v3247_v62 = vpop.f32.mrf.mxu0 }
 0x637   : > { %v1514_v0 = vpop.f32.mrf.mxu0 }
 0x639   : > { %v3248_v1 = vpop.f32.mrf.mxu0 }
 0x63a   : > { %v1611_v9 = vpack.c.bf16 %v3248_v1, %v3247_v62 }
 0x63b   : > { %v1517_v3 = vpop.f32.mrf.mxu0 }
 0x63c   : > { %v1610_v7 = vpack.c.bf16 %v1517_v3, %v1514_v0 }
 0x63d   : > { %v3251_v11 = vpop.f32.mrf.mxu0 }
 0x63e   : > { %3267 = vmatprep.mubr.msk.bf16.mxu0 %vm618_vm2, %v1610_v7 }
 0x63f   : > { %v1530_v14 = vpop.f32.mrf.mxu0  ;;  %3268 = vmatmul.mubr.msk.bf16.vlgmr.msra.gmra.mxu0 %vm618_vm2, %v1611_v9 }
 0x640   : > { %3271 = vmatprep.mubr.msk.bf16.mxu0 %vm618_vm2, %v1612_v8 }
 0x641   : > { %v3252_v16 = vpop.f32.mrf.mxu0 }
 0x642   : > { %v1712_v10 = vpack.c.bf16 %v3252_v16, %v3251_v11 }
 0x643   : > { %v1533_v18 = vpop.f32.mrf.mxu0 }
 0x644   : > { %v1711_v19 = vpack.c.bf16 %v1533_v18, %v1530_v14 }
 0x646   : > { %3279 = vmatprep.mubr.msk.bf16.mxu1 %vm618_vm2, %v1711_v19  ;;  %v3853_v19 = vadd.f32 %v2938_v29, %v3812_v60 }
 0x647   : > { %3272 = vmatmul.mubr.msk.bf16.gmra.mxu0 %vm618_vm2, %v1613_v21  ;;  %3280 = vmatmul.mubr.msk.bf16.vlgmr.msra.gmra.mxu1 %vm618_vm2, %v1712_v10 }
 0x648   : > { %3283 = vmatprep.mubr.msk.bf16.mxu1 %vm618_vm2, %v1713_v20  ;;  %3291 = vmatprep.mubr.msk.bf16.mxu0 %vm3497_vm6, %v3496_v23 }
 0x64f   : > { %3284 = vmatmul.mubr.msk.bf16.gmra.mxu1 %vm618_vm2, %v1714_v22 }
 0x650   : > { %3299 = vmatprep.mubr.msk.bf16.mxu1 %vm3497_vm6, %v3496_v23 }
 0x6ff   : > { %v3269_v25 = vpop.f32.mrf.mxu0 }
 0x700   : > { %v1705_v37 = vadd.f32 %v3269_v25, %v3831_v32 }
 0x701   : > { %v1672_v6 = vpop.f32.mrf.mxu0 }
 0x702   : > { %v1703_v0 = vadd.f32 %v1672_v6, %v3836_v52 }
 0x703   : > { %v3270_v30 = vpop.f32.mrf.mxu0 }
 0x704   : > { %v1706_v12 = vadd.f32 %v3270_v30, %v3833_v36 }
 0x705   : > { %v1675_v31 = vpop.f32.mrf.mxu0 }
 0x706   : > { %v1704_v46 = vadd.f32 %v1675_v31, %v3838_v57  ;;  %v3860_v31 = vld [vmem:[%s3588_s29] sm:$0xff]  }
 0x707   : > { %v3273_v33 = vpop.f32.mrf.mxu0  ;;  %v3281_v35 = vpop.f32.mrf.mxu1 }
 0x708   : > { %v1806_v62 = vadd.f32 %v3281_v35, %v1705_v37  ;;  %v1709_v13 = vadd.f32 %v3273_v33, %v3843_v2 }
 0x709   : > { %v1688_v38 = vpop.f32.mrf.mxu0  ;;  %v1773_v15 = vpop.f32.mrf.mxu1 }
 0x70a   : > { %v1814_v7 = vmax.f32 %v1806_v62, 0.0  ;;  %v1804_v8 = vadd.f32 %v1773_v15, %v1703_v0  ;;  %v1707_v22 = vadd.f32 %v1688_v38, %v3850_v17  ;;  %v3866_v62 = vld [vmem:[%s3588_s29 + $0x8] sm:$0xff]   ;;  %v3882_v0 = vld [vmem:[%s4061_s5 + $0x80] sm:$0xff]  }
 0x70b   : > { %v3282_v63 = vpop.f32.mrf.mxu1  ;;  %v3274_v51 = vpop.f32.mrf.mxu0 }
 0x70c   : > { %v1807_v1 = vadd.f32 %v3282_v63, %v1706_v12  ;;  %v1812_v20 = vmax.f32 %v1804_v8, 0.0  ;;  %v1710_v21 = vadd.f32 %v3274_v51, %v3846_v53  ;;  %v3875_v63 = vld [vmem:[%s4061_s5 + $0x88] sm:$0xff]  }
 0x70d   : > { %v1776_v3 = vpop.f32.mrf.mxu1  ;;  %v1691_v54 = vpop.f32.mrf.mxu0 }
 0x70e   : > { %v1815_v9 = vmax.f32 %v1807_v1, 0.0  ;;  %v1805_v50 = vadd.f32 %v1776_v3, %v1704_v46  ;;  %v1708_v25 = vadd.f32 %v1691_v54, %v3853_v19 }
 0x70f   : > { %v3285_v11 = vpop.f32.mrf.mxu1 }
 0x710   : > { %v1821_v14 = vpack.c.bf16 %v1815_v9, %v1814_v7  ;;  %v1813_v16 = vmax.f32 %v1805_v50, 0.0  ;;  %v1810_v10 = vadd.f32 %v3285_v11, %v1709_v13  ;;  %v2945_v13 = vld [vmem:[%s4062_s6 + $0x7] ss:$0 sm:$0xff] }
 0x711   : > { %v1789_v18 = vpop.f32.mrf.mxu1  ;;  %v3897_v54 = vadd.f32 %v2945_v13, %v3802_v44 }
 0x712   : > { %3288 = vmatpush3.bf16.msra.mxu0 %v1821_v14  ;;  %v1820_v6 = vpack.c.bf16 %v1813_v16, %v1812_v20  ;;  %v1818_v60 = vmax.f32 %v1810_v10, 0.0  ;;  %v1808_v29 = vadd.f32 %v1789_v18, %v1707_v22  ;;  %v3894_v14 = vadd.f32 %v3800_v43, %v2945_v13 }
 0x713   : > { %v3286_v59 = vpop.f32.mrf.mxu1  ;;  %3289 = vmatprep.subr.bf16.mxu0 %v3496_v23 }
 0x714   : > { %v1811_v58 = vadd.f32 %v3286_v59, %v1710_v21  ;;  %v1816_v12 = vmax.f32 %v1808_v29, 0.0  ;;  %v3901_v21 = vadd.f32 %v3804_v45, %v2945_v13  ;;  %v3905_v59 = vadd.f32 %v2945_v13, %v3806_v49 }
 0x715   : > { %v1792_v30 = vpop.f32.mrf.mxu1 }
 0x716   : > { %v1819_v33 = vmax.f32 %v1811_v58, 0.0  ;;  %v1809_v35 = vadd.f32 %v1792_v30, %v1708_v25  ;;  %3290 = vmatpush3.bf16.msra.mxu0 %v1820_v6 }
 0x717   : > { %3303 = vmatprep.subr.bf16.mxu0 %v3875_v63 }
 0x718   : > { %v1823_v37 = vpack.c.bf16 %v1819_v33, %v1818_v60  ;;  %v1817_v15 = vmax.f32 %v1809_v35, 0.0 }
 0x719   : > { %3292 = vmatmul.mubr.msk.bf16.vlgmr.msra.gmra.mxu0 %vm618_vm2, %v3860_v31 }
 0x71a   : > { %3296 = vmatpush3.bf16.msra.mxu1 %v1823_v37  ;;  %v1822_v38 = vpack.c.bf16 %v1817_v15, %v1816_v12  ;;  %3304 = vmatpush3.bf16.msra.mxu0 %v3875_v63 }
 0x71b   : > { %3297 = vmatprep.subr.bf16.mxu1 %v3496_v23  ;;  %3305 = vmatprep.subr.bf16.mxu0 %v3882_v0 }
 0x71e   : > { %3298 = vmatpush3.bf16.msra.mxu1 %v1822_v38  ;;  %3306 = vmatpush3.bf16.msra.mxu0 %v3882_v0 }
 0x721   : > { %3300 = vmatmul.mubr.msk.bf16.vlgmr.msra.gmra.mxu1 %vm618_vm2, %v3866_v62 }
 0x722   : > { %3313 = vmatprep.mubr.msk.bf16.mxu1 %vm777_vm3, %v3600_v24 }
 0x7d9   : > { %v1866_v46 = vpop.f32.mrf.mxu0 }
 0x7db   : > { %v3293_v24 = vpop.f32.mrf.mxu0 }
 0x7dd   : > { %v1869_v1 = vpop.f32.mrf.mxu0 }
 0x7de   : > { %v1922_v51 = vpack.c.bf16 %v1869_v1, %v1866_v46 }
 0x7df   : > { %v3294_v3 = vpop.f32.mrf.mxu0 }
 0x7e0   : > { %3307 = vmatprep.mubr.msk.bf16.mxu0 %vm618_vm2, %v1922_v51 }
 0x7e1   : > { %v1915_v7 = vpop.f32.mrf.mxu1 }
 0x7e3   : > { %v3301_v8 = vpop.f32.mrf.mxu1 }
 0x7e5   : > { %v1918_v9 = vpop.f32.mrf.mxu1 }
 0x7e6   : > { %v1923_v50 = vpack.c.bf16 %v1918_v9, %v1915_v7 }
 0x7e7   : > { %v3302_v11 = vpop.f32.mrf.mxu1 }
 0x7e8   : > { %3308 = vmatmul.mubr.msk.bf16.vlgmr.msra.gmra.mxu0 %vm618_vm2, %v1923_v50 }
 0x7e9   : > { %3323 = vmatprep.mubr.msk.bf16.mxu0 %vm777_vm3, %v3632_v47 }
 0x8a8   : > { %v3309_v16 = vpop.f32.mrf.mxu0 }
 0x8a9   : > { %v1993_v18 = vadd.f32 %v3309_v16, %v3894_v14 }
 0x8aa   : > { %v1976_v20 = vpop.f32.mrf.mxu0 }
 0x8ab   : > { %v1991_v10 = vadd.f32 %v1976_v20, %v3897_v54  ;;  %v3908_v22 = vadd.f32 %v1993_v18, %v3739_v48 }
 0x8ac   : > { %v3310_v47 = vpop.f32.mrf.mxu0 }
 0x8ad   : > { %v1994_v43 = vadd.f32 %v3310_v47, %v3901_v21  ;;  %v3912_v44 = vadd.f32 %v1991_v10, %v3705_v5  ;;  %v2001_v58 = vmax.f32 %v3908_v22, 0.0 }
 0x8ae   : > { %v1979_v25 = vpop.f32.mrf.mxu0 }
 0x8af   : > { %v3915_v6 = vadd.f32 %v1994_v43, %v3734_v34  ;;  %v1992_v45 = vadd.f32 %v1979_v25, %v3905_v59  ;;  %v1999_v60 = vmax.f32 %v3912_v44, 0.0 }
 0x8b1   : > { %v2002_v30 = vmax.f32 %v3915_v6, 0.0  ;;  %v3921_v49 = vadd.f32 %v1992_v45, %v3701_v4 }
 0x8b3   : > { %v2000_v29 = vmax.f32 %v3921_v49, 0.0  ;;  %v2004_v33 = vpack.c.bf16 %v2002_v30, %v2001_v58 }
 0x8b5   : > { %3321 = vmatprep.subr.bf16.mxu0 %v2004_v33  ;;  %v2003_v35 = vpack.c.bf16 %v2000_v29, %v1999_v60 }
 0x8b6   : > { %3322 = vmatpush3.bf16.msra.mxu0 %v2004_v33 }
 0x8b7   : > { %3311 = vmatprep.subr.bf16.mxu1 %v2003_v35  ;;  %3343 = vmatprep.subr.bf16.mxu0 %v3789_v41 }
 0x8b8   : > { %3312 = vmatpush3.bf16.msra.mxu1 %v2003_v35 }
 0x8b9   : > { %3324 = vmatmul.mubr.msk.bf16.vlgmr.msra.gmra.mxu0 %vm777_vm3, %v3643_v55  ;;  %3331 = vmatprep.subr.bf16.mxu1 %v3775_v39 }
 0x8ba   : > { %3327 = vmatprep.mubr.msk.bf16.mxu0 %vm777_vm3, %v3646_v56  ;;  %3344 = vmatpush3.bf16.msra.mxu0 %v3789_v41 }
 0x8bb   : > { %3314 = vmatmul.mubr.msk.bf16.vlgmr.msra.gmra.mxu1 %vm777_vm3, %v3607_v26  ;;  %3345 = vmatprep.subr.bf16.mxu0 %v3796_v42 }
 0x8bc   : > { %3317 = vmatprep.mubr.msk.bf16.mxu1 %vm777_vm3, %v3610_v27  ;;  %3332 = vmatpush3.bf16.msra.mxu1 %v3775_v39 }
 0x8bd   : > { %3333 = vmatprep.subr.bf16.mxu1 %v3782_v40 }
 0x8be   : > { %3346 = vmatpush3.bf16.msra.mxu0 %v3796_v42 }
 0x8bf   : > { %3363 = vmatprep.subr.bf16.mxu0 %v3496_v23 }
 0x8c0   : > { %3334 = vmatpush3.bf16.msra.mxu1 %v3782_v40 }
 0x8c1   : > { %3328 = vmatmul.mubr.msk.bf16.gmra.mxu0 %vm777_vm3, %v3654_v61  ;;  %3355 = vmatprep.subr.bf16.mxu1 %v3496_v23 }
 0x8c3   : > { %3318 = vmatmul.mubr.msk.bf16.gmra.mxu1 %vm777_vm3, %v3617_v28 }
 0x979   : > { %v3325_v26 = vpop.f32.mrf.mxu0 }
 0x97b   : > { %v3315_v27 = vpop.f32.mrf.mxu1  ;;  %v2104_v55 = vpop.f32.mrf.mxu0 }
 0x97d   : > { %v2039_v56 = vpop.f32.mrf.mxu1  ;;  %v3326_v39 = vpop.f32.mrf.mxu0 }
 0x97e   : > { %v2138_v9 = vpack.c.bf16 %v3326_v39, %v3325_v26 }
 0x97f   : > { %v3316_v41 = vpop.f32.mrf.mxu1  ;;  %v2107_v37 = vpop.f32.mrf.mxu0 }
 0x980   : > { %v2137_v38 = vpack.c.bf16 %v2107_v37, %v2104_v55  ;;  %v2136_v40 = vpack.c.bf16 %v3316_v41, %v3315_v27 }
 0x981   : > { %v2042_v42 = vpop.f32.mrf.mxu1  ;;  %v3329_v15 = vpop.f32.mrf.mxu0 }
 0x982   : > { %v2135_v12 = vpack.c.bf16 %v2042_v42, %v2039_v56 }
 0x983   : > { %v3319_v46 = vpop.f32.mrf.mxu1  ;;  %v2120_v24 = vpop.f32.mrf.mxu0 }
 0x984   : > { %3335 = vmatprep.mubr.msk.bf16.mxu1 %vm618_vm2, %v2135_v12 }
 0x985   : > { %v2055_v61 = vpop.f32.mrf.mxu1  ;;  %3336 = vmatmul.mubr.msk.bf16.vlgmr.msra.gmra.mxu1 %vm618_vm2, %v2136_v40  ;;  %v3330_v28 = vpop.f32.mrf.mxu0 }
 0x986   : > { %3339 = vmatprep.mubr.msk.bf16.mxu1 %vm618_vm2, %v2137_v38  ;;  %v2227_v11 = vpack.c.bf16 %v3330_v28, %v3329_v15 }
 0x987   : > { %v3320_v1 = vpop.f32.mrf.mxu1  ;;  %v2123_v51 = vpop.f32.mrf.mxu0 }
 0x988   : > { %v2226_v8 = vpack.c.bf16 %v2123_v51, %v2120_v24  ;;  %v2225_v50 = vpack.c.bf16 %v3320_v1, %v3319_v46 }
 0x989   : > { %v2058_v3 = vpop.f32.mrf.mxu1 }
 0x98a   : > { %v2224_v7 = vpack.c.bf16 %v2058_v3, %v2055_v61 }
 0x98c   : > { %3347 = vmatprep.mubr.msk.bf16.mxu0 %vm618_vm2, %v2224_v7 }
 0x98d   : > { %3340 = vmatmul.mubr.msk.bf16.gmra.mxu1 %vm618_vm2, %v2138_v9  ;;  %3348 = vmatmul.mubr.msk.bf16.vlgmr.msra.gmra.mxu0 %vm618_vm2, %v2225_v50 }
 0x98e   : > { %3351 = vmatprep.mubr.msk.bf16.mxu0 %vm618_vm2, %v2226_v8  ;;  %3359 = vmatprep.mubr.msk.bf16.mxu1 %vm3497_vm6, %v3496_v23 }
 0x995   : > { %3352 = vmatmul.mubr.msk.bf16.gmra.mxu0 %vm618_vm2, %v2227_v11 }
 0x996   : > { %3367 = vmatprep.mubr.msk.bf16.mxu0 %vm3497_vm6, %v3496_v23 }
 0xa45   : > { %v3337_v13 = vpop.f32.mrf.mxu1 }
 0xa46   : > { %v2218_v43 = vadd.f32 %v3337_v13, %v3831_v32 }
 0xa47   : > { %v2185_v16 = vpop.f32.mrf.mxu1 }
 0xa48   : > { %v2216_v27 = vadd.f32 %v2185_v16, %v3836_v52 }
 0xa49   : > { %v3338_v18 = vpop.f32.mrf.mxu1 }
 0xa4a   : > { %v2219_v33 = vadd.f32 %v3338_v18, %v3833_v36 }
 0xa4b   : > { %v2188_v20 = vpop.f32.mrf.mxu1 }
 0xa4c   : > { %v2217_v55 = vadd.f32 %v2188_v20, %v3838_v57 }
 0xa4d   : > { %v3341_v10 = vpop.f32.mrf.mxu1  ;;  %v3349_v47 = vpop.f32.mrf.mxu0 }
 0xa4e   : > { %v2307_v35 = vadd.f32 %v3349_v47, %v2218_v43  ;;  %v2222_v32 = vadd.f32 %v3341_v10, %v3843_v2 }
 0xa4f   : > { %v2201_v25 = vpop.f32.mrf.mxu1  ;;  %v2274_v45 = vpop.f32.mrf.mxu0 }
 0xa50   : > { %v2315_v37 = vmax.f32 %v2307_v35, 0.0  ;;  %v2305_v42 = vadd.f32 %v2274_v45, %v2216_v27  ;;  %v2220_v1 = vadd.f32 %v2201_v25, %v3850_v17  ;;  %v3481_v45 = vld [vmem:[%s4063_s7 + $0x8] sm:$0xff]  }
 0xa51   : > { %v3350_v26 = vpop.f32.mrf.mxu0  ;;  %v3342_v39 = vpop.f32.mrf.mxu1 }
 0xa52   : > { %v2308_v56 = vadd.f32 %v3350_v26, %v2219_v33  ;;  %v2313_v61 = vmax.f32 %v2305_v42, 0.0  ;;  %v2223_v28 = vadd.f32 %v3342_v39, %v3846_v53 }
 0xa53   : > { %v2277_v41 = vpop.f32.mrf.mxu0  ;;  %v2204_v24 = vpop.f32.mrf.mxu1 }
 0xa54   : > { %v2316_v15 = vmax.f32 %v2308_v56, 0.0  ;;  %v2306_v12 = vadd.f32 %v2277_v41, %v2217_v55  ;;  %v2221_v51 = vadd.f32 %v2204_v24, %v3853_v19  ;;  %v3482_v55 = vld [vmem:[%s4063_s7] sm:$0xff]  }
 0xa55   : > { %v3353_v38 = vpop.f32.mrf.mxu0 }
 0xa56   : > { %v2322_v40 = vpack.c.bf16 %v2316_v15, %v2315_v37  ;;  %v2314_v46 = vmax.f32 %v2306_v12, 0.0  ;;  %v2311_v52 = vadd.f32 %v3353_v38, %v2222_v32 }
 0xa57   : > { %v2290_v36 = vpop.f32.mrf.mxu0 }
 0xa58   : > { %3356 = vmatpush3.bf16.msra.mxu1 %v2322_v40  ;;  %v2321_v3 = vpack.c.bf16 %v2314_v46, %v2313_v61  ;;  %v2319_v2 = vmax.f32 %v2311_v52, 0.0  ;;  %v2309_v9 = vadd.f32 %v2290_v36, %v2220_v1 }
 0xa59   : > { %v3354_v57 = vpop.f32.mrf.mxu0  ;;  %3357 = vmatprep.subr.bf16.mxu1 %v3496_v23 }
 0xa5a   : > { %v2312_v7 = vadd.f32 %v3354_v57, %v2223_v28  ;;  %v2317_v16 = vmax.f32 %v2309_v9, 0.0  ;;  %v3483_v28 = vld [vmem:[%s4061_s5 + $0x98] sm:$0xff]  }
 0xa5b   : > { %v2293_v8 = vpop.f32.mrf.mxu0 }
 0xa5c   : > { %v2320_v50 = vmax.f32 %v2312_v7, 0.0  ;;  %v2310_v11 = vadd.f32 %v2293_v8, %v2221_v51  ;;  %3358 = vmatpush3.bf16.msra.mxu1 %v2321_v3 }
 0xa5d   : > { %3371 = vmatprep.subr.bf16.mxu1 %v3875_v63 }
 0xa5e   : > { %v2324_v53 = vpack.c.bf16 %v2320_v50, %v2319_v2  ;;  %v2318_v13 = vmax.f32 %v2310_v11, 0.0 }
 0xa5f   : > { %3360 = vmatmul.mubr.msk.bf16.vlgmr.msra.gmra.mxu1 %vm618_vm2, %v3860_v31 }
 0xa60   : > { %3364 = vmatpush3.bf16.msra.mxu0 %v2324_v53  ;;  %3372 = vmatpush3.bf16.msra.mxu1 %v3875_v63  ;;  %v2323_v17 = vpack.c.bf16 %v2318_v13, %v2317_v16  ;;  %v3485_v13 = vld [vmem:[%s4064_s8 + $0x8] sm:$0xff]   ;;  %v3486_v16 = vld [vmem:[%s4064_s8] sm:$0xff]  }
 0xa61   : > { %3365 = vmatprep.subr.bf16.mxu0 %v3496_v23  ;;  %3373 = vmatprep.subr.bf16.mxu1 %v3882_v0 }
 0xa64   : > { %3366 = vmatpush3.bf16.msra.mxu0 %v2323_v17  ;;  %3374 = vmatpush3.bf16.msra.mxu1 %v3882_v0  ;;  %v3479_v0 = vld [vmem:[%s4063_s7 + $0x18] sm:$0xff]  }
 0xa65   : > { %3379 = vmatprep.subr.bf16.mxu0 %v3479_v0  ;;  %3391 = vmatprep.subr.bf16.mxu1 %v3483_v28 }
 0xa67   : > { %3368 = vmatmul.mubr.msk.bf16.vlgmr.msra.gmra.mxu0 %vm618_vm2, %v3866_v62  ;;  %v3480_v62 = vld [vmem:[%s4063_s7 + $0x10] sm:$0xff]  }
 0xa68   : > { %3380 = vmatpush3.bf16.msra.mxu0 %v3479_v0 }
 0xa69   : > { %3381 = vmatprep.subr.bf16.mxu0 %v3480_v62 }
 0xa6c   : > { %3382 = vmatpush3.bf16.msra.mxu0 %v3480_v62 }
 0xa6d   : > { %3383 = vmatprep.subr.bf16.mxu0 %v3481_v45 }
 0xa70   : > { %3384 = vmatpush3.bf16.msra.mxu0 %v3481_v45 }
 0xa71   : > { %3385 = vmatprep.subr.bf16.mxu0 %v3482_v55 }
 0xa74   : > { %3386 = vmatpush3.bf16.msra.mxu0 %v3482_v55 }
 0xb1f   : > { %v2359_v19 = vpop.f32.mrf.mxu1 }
 0xb21   : > { %v3361_v18 = vpop.f32.mrf.mxu1 }
 0xb22   : > { %v3005_v18 = vld [vmem:[%s4062_s6 + $0x9] ss:$0 sm:$0xff] }
 0xb23   : > { %v2362_v20 = vpop.f32.mrf.mxu1 }
 0xb24   : > { %v2407_v10 = vpack.c.bf16 %v2362_v20, %v2359_v19 }
 0xb25   : > { %v3362_v31 = vpop.f32.mrf.mxu1 }
 0xb26   : > { %3375 = vmatprep.mubr.msk.bf16.mxu1 %vm618_vm2, %v2407_v10 }
 0xb27   : > { %v2400_v47 = vpop.f32.mrf.mxu0 }
 0xb29   : > { %v3369_v63 = vpop.f32.mrf.mxu0 }
 0xb2b   : > { %v2403_v43 = vpop.f32.mrf.mxu0 }
 0xb2c   : > { %v2408_v23 = vpack.c.bf16 %v2403_v43, %v2400_v47 }
 0xb2d   : > { %v3370_v25 = vpop.f32.mrf.mxu0 }
 0xb2e   : > { %3376 = vmatmul.mubr.msk.bf16.vlgmr.msra.gmra.mxu1 %vm618_vm2, %v2408_v23 }
 0xb2f   : > { %3392 = vmatpush3.bf16.msra.mxu1 %v3483_v28 }
 0xbee   : > { %v3377_v33 = vpop.f32.mrf.mxu1 }
 0xbef   : > { %v2466_v35 = vadd.f32 %v3377_v33, %v3894_v14 }
 0xbf0   : > { %v2449_v26 = vpop.f32.mrf.mxu1 }
 0xbf1   : > { %v2464_v27 = vadd.f32 %v2449_v26, %v3897_v54  ;;  %v2470_v39 = vadd.f32 %v2466_v35, %v2001_v58  ;;  %v3010_v26 = vld [vmem:[%s4065_s9] ss:$0 sm:$0xff] }
 0xbf2   : > { %v3378_v56 = vpop.f32.mrf.mxu1 }
 0xbf3   : > { %v2467_v41 = vadd.f32 %v3378_v56, %v3901_v21  ;;  %v2468_v14 = vadd.f32 %v2464_v27, %v1999_v60  ;;  %v2474_v15 = vmax.f32 %v2470_v39, 0.0 }
 0xbf4   : > { %v2452_v37 = vpop.f32.mrf.mxu1 }
 0xbf5   : > { %v2471_v42 = vadd.f32 %v2467_v41, %v2002_v30  ;;  %v2465_v54 = vadd.f32 %v2452_v37, %v3905_v59  ;;  %v2472_v22 = vmax.f32 %v2468_v14, 0.0 }
 0xbf7   : > { %v2475_v12 = vmax.f32 %v2471_v42, 0.0  ;;  %v2469_v38 = vadd.f32 %v2465_v54, %v2000_v29 }
 0xbf9   : > { %v2473_v58 = vmax.f32 %v2469_v38, 0.0  ;;  %v3446_v32 = vpack.i.bf16 %v2475_v12, %v2474_v15 }
 0xbfb   : > { %3447 = vrot.lane.b32.xlu1 %v3446_v32, %s3498_s28  ;;  %v3441_v21 = vpack.i.bf16 %v2473_v58, %v2472_v22 }
 0xbfd   : > { %3442 = vrot.lane.b32.xlu0 %v3441_v21, %s3498_s28  ;;  %s416_s28 = scalar_lea.vmem %s4066_s10, %s3017_s18 }
 0xc6d   : > { %v3448_v40 = vpop.permute.xlu1 %3447 }
 0xc6e   : > { %v3450_v44 = vunpack.i.h.bf16 %v3448_v40  ;;  %v3449_v60 = vunpack.i.l.bf16 %v3448_v40 }
 0xc6f   : > { %v3443_v46 = vpop.permute.xlu0 %3442 }
 0xc70   : > { %v3445_v6 = vunpack.i.h.bf16 %v3443_v46  ;;  %v3444_v30 = vunpack.i.l.bf16 %v3443_v46  ;;  %v2495_v59 = vsel %vm618_vm2, %v3734_v34, %v3450_v44  ;;  %v2494_v49 = vsel %vm618_vm2, %v3739_v48, %v3449_v60  ;;  %v3484_v34 = vld [vmem:[%s4061_s5 + $0x90] sm:$0xff]  }
 0xc71   : > { %v2497_v61 = vpack.c.bf16 %v2495_v59, %v2494_v49  ;;  %3393 = vmatprep.subr.bf16.mxu1 %v3484_v34 }
 0xc72   : > { %v2493_v29 = vsel %vm618_vm2, %v3701_v4, %v3445_v6  ;;  %v2492_v24 = vsel %vm618_vm2, %v3705_v5, %v3444_v30  ;;  %3394 = vmatpush3.bf16.msra.mxu1 %v3484_v34  ;;  %v2998_v5 = vld [vmem:[%s4062_s6 + $0x8] ss:$0 sm:$0xff] }
 0xc73   : > { %v2496_v36 = vpack.c.bf16 %v2493_v29, %v2492_v24  ;;  %3399 = vmatprep.subr.bf16.mxu1 %v3485_v13 }
 0xc75   : > { %3387 = vmatprep.mubr.msk.bf16.mxu0 %vm2528_vm7, %v2496_v36 }
 0xc76   : > { %3388 = vmatmul.mubr.msk.bf16.vlgmr.msra.gmra.mxu0 %vm2528_vm7, %v2497_v61 }
 0xd36   : > { %v3389_v4 = vpop.f32.mrf.mxu0 }
 0xd37   : > { %v2578_v51 = vadd.f32 %v3389_v4, %v2998_v5 }
 0xd38   : > { %v2569_v48 = vpop.f32.mrf.mxu0 }
 0xd39   : > { %v2570_v57 = vadd.f32 %v2998_v5, %v2569_v48  ;;  %v2586_v50 = vmax.f32 %v2578_v51, 0.0 }
 0xd3a   : > { %v3390_v52 = vpop.f32.mrf.mxu0 }
 0xd3b   : > { %v2581_v1 = vadd.f32 %v3390_v52, %v2998_v5  ;;  %v2584_v2 = vmax.f32 %v2570_v57, 0.0 }
 0xd3c   : > { %v2572_v3 = vpop.f32.mrf.mxu0 }
 0xd3d   : > { %v2573_v7 = vadd.f32 %v2998_v5, %v2572_v3  ;;  %v2587_v8 = vmax.f32 %v2581_v1, 0.0 }
 0xd3f   : > { %v2585_v9 = vmax.f32 %v2573_v7, 0.0  ;;  %v2589_v53 = vpack.c.bf16 %v2587_v8, %v2586_v50 }
 0xd41   : > { %v2588_v11 = vpack.c.bf16 %v2585_v9, %v2584_v2 }
 0xd43   : > { %3395 = vmatprep.mubr.msk.bf16.mxu1 %vm618_vm2, %v2588_v11 }
 0xd44   : > { %3396 = vmatmul.mubr.msk.bf16.vlgmr.msra.gmra.mxu1 %vm618_vm2, %v2589_v53 }
 0xd45   : > { %3400 = vmatpush3.bf16.msra.mxu1 %v3485_v13 }
 0xd46   : > { %3401 = vmatprep.subr.bf16.mxu1 %v3486_v16 }
 0xd49   : > { %3402 = vmatpush3.bf16.msra.mxu1 %v3486_v16 }
 0xe04   : > { %v3397_v17 = vpop.f32.mrf.mxu1 }
 0xe05   : > { %v2657_v47 = vadd.f32 %v3397_v17, %v3005_v18 }
 0xe06   : > { %v2648_v19 = vpop.f32.mrf.mxu1 }
 0xe07   : > { %v2649_v10 = vadd.f32 %v3005_v18, %v2648_v19  ;;  %v2665_v62 = vmax.f32 %v2657_v47, 0.0 }
 0xe08   : > { %v3398_v20 = vpop.f32.mrf.mxu1 }
 0xe09   : > { %v2660_v31 = vadd.f32 %v3398_v20, %v3005_v18  ;;  %v2663_v25 = vmax.f32 %v2649_v10, 0.0 }
 0xe0a   : > { %v2651_v63 = vpop.f32.mrf.mxu1 }
 0xe0b   : > { %v2652_v43 = vadd.f32 %v3005_v18, %v2651_v63  ;;  %v2666_v23 = vmax.f32 %v2660_v31, 0.0 }
 0xe0d   : > { %v2664_v0 = vmax.f32 %v2652_v43, 0.0  ;;  %v2668_v33 = vpack.c.bf16 %v2666_v23, %v2665_v62 }
 0xe0f   : > { %v2667_v45 = vpack.c.bf16 %v2664_v0, %v2663_v25 }
 0xe11   : > { %3403 = vmatprep.mubr.msk.bf16.mxu1 %vm618_vm2, %v2667_v45 }
 0xe12   : > { %3404 = vmatmul.mubr.msk.bf16.vlgmr.msra.gmra.mxu1 %vm618_vm2, %v2668_v33 }
 0xed2   : > { %v3405_v35 = vpop.f32.mrf.mxu1 }
 0xed3   : > { %v2736_v56 = vadd.f32 %v3405_v35, %v3010_v26 }
 0xed4   : > { %v2727_v27 = vpop.f32.mrf.mxu1 }
 0xed5   : > { %v2728_v55 = vadd.f32 %v3010_v26, %v2727_v27  ;;  %2744 = vst.msk [vmem:[%s416_s28 + $0x10] sm:$0xff] %vm534_vm1, %v2736_v56 }
 0xed6   : > { %v3406_v39 = vpop.f32.mrf.mxu1 }
 0xed7   : > { %2742 = vst.msk [vmem:[%s416_s28] sm:$0xff] %vm534_vm1, %v2728_v55  ;;  %v2739_v14 = vadd.f32 %v3406_v39, %v3010_v26 }
 0xed8   : > { %v2730_v41 = vpop.f32.mrf.mxu1 }
 0xed9   : > { %v2731_v37 = vadd.f32 %v3010_v26, %v2730_v41  ;;  %2745 = vst.msk [vmem:[%s416_s28 + $0x18] sm:$0xff] %vm534_vm1, %v2739_v14 }
 0xedb   : > { %2743 = vst.msk [vmem:[%s416_s28 + $0x8] sm:$0xff] %vm534_vm1, %v2731_v37 }
 0xedc PF: > { %s20_s13 = sadd.s32 1, %s3493_s13  }
 0xedd   : > { %p17_p4 = scmp.ge.s32.totalorder %s20_s13, 6  }
 0xedf   :  { %19 = sbr.rel (!%p17_p4) target bundleno = 1 (0x1), region = 114 }

</bundles_post_ra>
